<compile_context>
chip_gen: v7x
topology: tpu7x:2x2x1
jax: 0.10.0
libtpu: 0.0.40
codegen_flags: <defaults>
</compile_context>

<pallas_src>
import jax
import jax.numpy as jnp
from jax import lax
from jax.experimental import pallas as pl
from jax.experimental.pallas import tpu as pltpu


def _round_up(v, m):
    return ((v + m - 1) // m) * m


def _vmem_capacity_bytes():
    try:
        cap = int(pltpu.get_tpu_info().vmem_capacity_bytes)
        if cap > 0:
            return cap
    except Exception:
        pass
    return 64 * 1024 * 1024  # conservative (v7x per-TC VMEM)


def _plan_tiles(c, hw, f_pad, out_pad, x_itemsize, hw_chunk):
    """Pick the spatial chunk THW and a vmem limit from actual tile sizes."""
    cap = _vmem_capacity_bytes()
    # Streaming budget covers 2x double-buffered x blocks + ~2x (F_pad, THW) f32
    # h temporaries.  ~16 MiB on 128 MiB VMEM parts (v5e/v6e), ~8 MiB on v7x.
    chunk_budget = max(4 << 20, min(16 << 20, cap // 8))
    per_col = 2 * c * x_itemsize + 2 * f_pad * 4

    ragged = False
    if hw_chunk is not None:
        thw = int(hw_chunk)
        assert thw == hw or thw % 128 == 0, (hw, thw)
        assert thw <= hw, (hw, thw)
        ragged = (hw % thw) != 0
    elif hw * per_col <= chunk_budget:
        thw = hw                                   # single chunk: k axis collapses
    else:
        max_thw = max(128, (chunk_budget // per_col) // 128 * 128)
        thw = 0
        t = min(max_thw, (hw // 128) * 128)
        while t >= 128:                            # largest 128-mult divisor in budget
            if hw % t == 0:
                thw = t
                break
            t -= 128
        if thw == 0:                               # no clean divisor: ragged last chunk
            thw = max_thw
            ragged = True
    k_steps = -(-hw // thw)

    # Per-TC VMEM accounting: 2x-buffered resident weights + output blocks +
    # accumulator + streaming tiles + finalize (iota-mask) transient + slack.
    resident = (2 * (f_pad * c + f_pad + f_pad * out_pad + out_pad) * 4
                + 2 * (f_pad + out_pad) * 4
                + f_pad * 4)
    streaming = 2 * c * thw * x_itemsize + 2 * f_pad * thw * 4
    finalize = 3 * f_pad * f_pad * 4
    need = resident + streaming + finalize + (2 << 20)
    vmem_limit = int(min(max(need * 5 // 4, 16 << 20), cap * 3 // 4))
    return thw, k_steps, ragged, vmem_limit


def iclassifier_forward(x_nchw, w1, b1, wfc, bfc, *, hw_chunk=None):
    """x_nchw: (N, C, H, W) in its producer dtype (f32 or bf16).
    Returns (feats (N, F), logits (N, OUT))."""
    n, c, hh, ww = x_nchw.shape
    hw = hh * ww
    f = w1.shape[1]
    out = wfc.shape[1]
    f_pad = _round_up(f, 128)
    out_pad = _round_up(out, 128)
    x_itemsize = jnp.dtype(x_nchw.dtype).itemsize

    thw, k_steps, ragged, vmem_limit = _plan_tiles(c, hw, f_pad, out_pad,
                                                   x_itemsize, hw_chunk)
    inv_hw = 1.0 / float(hw)
    use_vpu_conv = c <= 16  # K=C matmul wastes the MXU; do C broadcast-FMAs on the VPU

    # Free reshape (no HBM transpose, no dtype cast): spatial on the lane axis.
    x = x_nchw.reshape(n, c, hw)

    # Padded, VMEM-resident parameters (f32, tiny).  w1 is used transposed: (F_pad, C).
    w1t = jnp.zeros((f_pad, c), jnp.float32).at[:f, :].set(w1.T.astype(jnp.float32))
    b1p = jnp.zeros((f_pad, 1), jnp.float32).at[:f, 0].set(b1.astype(jnp.float32))
    wfcp = jnp.zeros((f_pad, out_pad), jnp.float32).at[:f, :out].set(wfc.astype(jnp.float32))
    bfcp = jnp.zeros((1, out_pad), jnp.float32).at[0, :out].set(bfc.astype(jnp.float32))

    def kernel(x_ref, w1t_ref, b1_ref, wfc_ref, bfc_ref,
               feats_ref, logits_ref, acc_ref):
        k = pl.program_id(1)

        @pl.when(k == 0)
        def _init():
            acc_ref[...] = jnp.zeros_like(acc_ref)

        xb = x_ref[0]                                        # (C, THW), producer dtype
        wt = w1t_ref[...]                                    # (F_pad, C) f32

        if use_vpu_conv:
            # 1x1 conv as C broadcast-FMAs on the VPU (MXU stays free).
            h = wt[:, 0:1] * xb[0:1, :].astype(jnp.float32)  # (F_pad, THW) f32
            for ci in range(1, c):
                h = h + wt[:, ci:ci + 1] * xb[ci:ci + 1, :].astype(jnp.float32)
        else:
            # Larger C: MXU matmul, default precision, f32 accumulation.
            h = jnp.dot(wt, xb.astype(jnp.float32),
                        preferred_element_type=jnp.float32)
        h = jnp.maximum(h + b1_ref[...], 0.0)                # bias + ReLU (VPU)

        if ragged:
            # Last chunk may extend past HW: zero the out-of-bounds columns.
            pos = k * thw + lax.broadcasted_iota(jnp.int32, (1, thw), 1)
            h = jnp.where(pos < hw, h, 0.0)

        # Pool this spatial chunk on the XLU: lane reduce -> (F_pad, 1) column.
        acc_ref[...] += jnp.sum(h, axis=-1, keepdims=True)

        @pl.when(k == k_steps - 1)
        def _finalize():
            col = acc_ref[...] * inv_hw                      # (F_pad, 1) f32
            # Column -> lane-dense row, once per sample: diagonal mask + sublane
            # reduce (standard ops; avoids an unsupported narrow transpose).
            rid = lax.broadcasted_iota(jnp.int32, (f_pad, f_pad), 0)
            cid = lax.broadcasted_iota(jnp.int32, (f_pad, f_pad), 1)
            feats_row = jnp.sum(jnp.where(rid == cid, col, 0.0),
                                axis=0, keepdims=True)        # (1, F_pad)
            feats_ref[0] = feats_row.astype(feats_ref.dtype)
            # fc head: once per sample; HIGHEST kept here only (negligible cost,
            # preserves f32 Linear semantics).
            logits = jnp.dot(feats_row, wfc_ref[...],
                             precision=lax.Precision.HIGHEST,
                             preferred_element_type=jnp.float32) + bfc_ref[...]
            logits_ref[0] = logits.astype(logits_ref.dtype)

    grid_spec = pltpu.PrefetchScalarGridSpec(
        num_scalar_prefetch=0,
        grid=(n, k_steps),                                    # (sample, spatial chunk)
        in_specs=[
            pl.BlockSpec((1, c, thw), lambda i, k: (i, 0, k)),      # x chunk (streamed)
            pl.BlockSpec((f_pad, c), lambda i, k: (0, 0)),          # w1t (resident)
            pl.BlockSpec((f_pad, 1), lambda i, k: (0, 0)),          # b1  (resident)
            pl.BlockSpec((f_pad, out_pad), lambda i, k: (0, 0)),    # wfc (resident)
            pl.BlockSpec((1, out_pad), lambda i, k: (0, 0)),        # bfc (resident)
        ],
        out_specs=[
            pl.BlockSpec((1, 1, f_pad), lambda i, k: (i, 0, 0)),    # feats (lane-dense)
            pl.BlockSpec((1, 1, out_pad), lambda i, k: (i, 0, 0)),  # logits (lane-dense)
        ],
        scratch_shapes=[pltpu.VMEM((f_pad, 1), jnp.float32)],       # pooled-sum column
    )

    cost = pl.CostEstimate(
        flops=2 * n * hw * c * f_pad + 3 * n * hw * f_pad + 2 * n * f_pad * out_pad,
        transcendentals=0,
        bytes_accessed=(n * c * hw * x_itemsize
                        + (f_pad * c + f_pad + f_pad * out_pad + out_pad) * 4
                        + n * (f_pad + out_pad) * 4),
    )

    feats_p, logits_p = pl.pallas_call(
        kernel,
        out_shape=(jax.ShapeDtypeStruct((n, 1, f_pad), jnp.float32),
                   jax.ShapeDtypeStruct((n, 1, out_pad), jnp.float32)),
        grid_spec=grid_spec,
        compiler_params=pltpu.CompilerParams(
            dimension_semantics=("parallel", "arbitrary"),
            vmem_limit_bytes=vmem_limit),
        cost_estimate=cost,
    )(x, w1t, b1p, wfcp, bfcp)

    feats = feats_p.reshape(n, f_pad)[:, :f]
    logits = logits_p.reshape(n, out_pad)[:, :out]
    return feats, logits


def _reference_forward(x_nchw, w1, b1, wfc, bfc):
    """Pure-JAX reference of the same semantics."""
    n, c, hh, ww = x_nchw.shape
    xs = x_nchw.astype(jnp.float32).reshape(n, c, hh * ww)
    hmap = jnp.einsum("ncs,cf->nsf", xs, w1, precision=lax.Precision.HIGHEST)
    hmap = jnp.maximum(hmap + b1[None, None, :], 0.0)
    feats = jnp.mean(hmap, axis=1)
    logits = jnp.dot(feats, wfc, precision=lax.Precision.HIGHEST) + bfc[None, :]
    return feats, logits


if __name__ == "__main__":
    # Small shapes consistent with the module's forward.
    N, C_IN, H, W = 2, 4, 16, 16      # input batch (NCHW)
    FEATURE_SIZE = 32                 # feature_size
    OUTPUT_CLASS = 8                  # output_class

    key = jax.random.PRNGKey(0)
    kx, kx2, k1, kb1, k2, kb2 = jax.random.split(key, 6)

    x = jax.random.normal(kx, (N, C_IN, H, W), dtype=jnp.float32)
    w1 = jax.random.normal(k1, (C_IN, FEATURE_SIZE), dtype=jnp.float32) * 0.1
    b1 = jax.random.normal(kb1, (FEATURE_SIZE,), dtype=jnp.float32) * 0.1
    wfc = jax.random.normal(k2, (FEATURE_SIZE, OUTPUT_CLASS), dtype=jnp.float32) * 0.1
    bfc = jax.random.normal(kb2, (OUTPUT_CLASS,), dtype=jnp.float32) * 0.1

    ref_feats, ref_logits = _reference_forward(x, w1, b1, wfc, bfc)

    # (1) f32, HW forced into 2 exact chunks (exercises zero/accumulate/finalize).
    feats, logits = iclassifier_forward(x, w1, b1, wfc, bfc, hw_chunk=128)
    jax.block_until_ready((feats, logits))
    assert feats.shape == (N, FEATURE_SIZE) and logits.shape == (N, OUTPUT_CLASS)
    assert jnp.allclose(feats, ref_feats, atol=1e-4, rtol=1e-4)
    assert jnp.allclose(logits, ref_logits, atol=1e-4, rtol=1e-4)

    # (2) f32, auto plan (whole HW fits the budget -> reduction axis collapses).
    feats_a, logits_a = iclassifier_forward(x, w1, b1, wfc, bfc)
    jax.block_until_ready((feats_a, logits_a))
    assert jnp.allclose(feats_a, ref_feats, atol=1e-4, rtol=1e-4)
    assert jnp.allclose(logits_a, ref_logits, atol=1e-4, rtol=1e-4)

    # (3) ragged spatial extent (HW=324, chunk=256 -> masked last chunk).
    xr = jax.random.normal(kx2, (N, C_IN, 18, 18), dtype=jnp.float32)
    ref_feats_r, ref_logits_r = _reference_forward(xr, w1, b1, wfc, bfc)
    feats_r, logits_r = iclassifier_forward(xr, w1, b1, wfc, bfc, hw_chunk=256)
    jax.block_until_ready((feats_r, logits_r))
    assert jnp.allclose(feats_r, ref_feats_r, atol=1e-4, rtol=1e-4)
    assert jnp.allclose(logits_r, ref_logits_r, atol=1e-4, rtol=1e-4)

    # (4) bf16 producer path: x arrives already bf16 in HBM (cast here stands in
    # for the upstream producer emitting bf16; no cast inside the wrapper).
    feats16, logits16 = iclassifier_forward(x.astype(jnp.bfloat16), w1, b1, wfc, bfc)
    jax.block_until_ready((feats16, logits16))
    assert jnp.allclose(feats16, ref_feats, atol=3e-2, rtol=3e-2)
    assert jnp.allclose(logits16, ref_logits, atol=3e-2, rtol=3e-2)

    print("KERNEL_OK")
</pallas_src>

<mosaic_0001>
module attributes {stable_mosaic.version = 11 : i64} {
  func.func @kernel(%arg0: i32, %arg1: i32, %arg2: memref<1x4x128xf32, #tpu.memory_space<vmem>>, %arg3: memref<128x4xf32, #tpu.memory_space<vmem>>, %arg4: memref<128x1xf32, #tpu.memory_space<vmem>>, %arg5: memref<128x128xf32, #tpu.memory_space<vmem>>, %arg6: memref<1x128xf32, #tpu.memory_space<vmem>>, %arg7: memref<1x1x128xf32, #tpu.memory_space<vmem>>, %arg8: memref<1x1x128xf32, #tpu.memory_space<vmem>>, %arg9: memref<128x1xf32, #tpu.memory_space<vmem>>) attributes {dimension_semantics = [#tpu.dimension_semantics<parallel>, #tpu.dimension_semantics<arbitrary>], iteration_bounds = array<i64: 2, 2>, scalar_prefetch = 0 : i64, scratch_operands = 1 : i64, tpu.core_type = #tpu.core_type<tc>, window_params = [{transform_indices = @transform_0, window_bounds = array<i64: 1, 4, 128>}, {pipeline_mode = #tpu.pipeline_mode<synchronous>, transform_indices = @transform_1, window_bounds = array<i64: 128, 4>}, {pipeline_mode = #tpu.pipeline_mode<synchronous>, transform_indices = @transform_2, window_bounds = array<i64: 128, 1>}, {pipeline_mode = #tpu.pipeline_mode<synchronous>, transform_indices = @transform_3, window_bounds = array<i64: 128, 128>}, {pipeline_mode = #tpu.pipeline_mode<synchronous>, transform_indices = @transform_4, window_bounds = array<i64: 1, 128>}, {transform_indices = @transform_5, window_bounds = array<i64: 1, 1, 128>}, {transform_indices = @transform_6, window_bounds = array<i64: 1, 1, 128>}]} {
    %c0_i32 = arith.constant 0 : i32
    %0 = arith.cmpi eq, %arg1, %c0_i32 : i32
    %1 = arith.extui %0 : i1 to i32
    %c0_i32_0 = arith.constant 0 : i32
    %2 = arith.cmpi ne, %1, %c0_i32_0 : i32
    scf.if %2 {
      %cst_13 = arith.constant 0.000000e+00 : f32
      %42 = vector.broadcast %cst_13 : f32 to vector<128x1xf32>
      %c0_14 = arith.constant 0 : index
      %c0_15 = arith.constant 0 : index
      %43 = vector.load %arg9[%c0_14, %c0_15] : memref<128x1xf32, #tpu.memory_space<vmem>>, vector<128x1xf32>
      tpu.vector_store %arg9[%c0_14, %c0_15], %42 {strides = array<i32>} : memref<128x1xf32, #tpu.memory_space<vmem>>, vector<128x1xf32>,
    } else {
    }
    %c0 = arith.constant 0 : index
    %c0_1 = arith.constant 0 : index
    %c0_2 = arith.constant 0 : index
    %3 = vector.load %arg2[%c0, %c0_1, %c0_2] : memref<1x4x128xf32, #tpu.memory_space<vmem>>, vector<1x4x128xf32>
    %4 = vector.shape_cast %3 : vector<1x4x128xf32> to vector<4x128xf32>
    %c0_3 = arith.constant 0 : index
    %c0_4 = arith.constant 0 : index
    %5 = vector.load %arg3[%c0_3, %c0_4] : memref<128x4xf32, #tpu.memory_space<vmem>>, vector<128x4xf32>
    %6 = vector.extract_strided_slice %5 {offsets = [0, 0], sizes = [128, 1], strides = [1, 1]} : vector<128x4xf32> to vector<128x1xf32>
    %7 = vector.extract_strided_slice %4 {offsets = [0, 0], sizes = [1, 128], strides = [1, 1]} : vector<4x128xf32> to vector<1x128xf32>
    %8 = vector.broadcast %6 : vector<128x1xf32> to vector<128x128xf32>
    %9 = vector.broadcast %7 : vector<1x128xf32> to vector<128x128xf32>
    %10 = arith.mulf %8, %9 : vector<128x128xf32>
    %11 = vector.extract_strided_slice %5 {offsets = [0, 1], sizes = [128, 1], strides = [1, 1]} : vector<128x4xf32> to vector<128x1xf32>
    %12 = vector.extract_strided_slice %4 {offsets = [1, 0], sizes = [1, 128], strides = [1, 1]} : vector<4x128xf32> to vector<1x128xf32>
    %13 = vector.broadcast %11 : vector<128x1xf32> to vector<128x128xf32>
    %14 = vector.broadcast %12 : vector<1x128xf32> to vector<128x128xf32>
    %15 = arith.mulf %13, %14 : vector<128x128xf32>
    %16 = arith.addf %10, %15 : vector<128x128xf32>
    %17 = vector.extract_strided_slice %5 {offsets = [0, 2], sizes = [128, 1], strides = [1, 1]} : vector<128x4xf32> to vector<128x1xf32>
    %18 = vector.extract_strided_slice %4 {offsets = [2, 0], sizes = [1, 128], strides = [1, 1]} : vector<4x128xf32> to vector<1x128xf32>
    %19 = vector.broadcast %17 : vector<128x1xf32> to vector<128x128xf32>
    %20 = vector.broadcast %18 : vector<1x128xf32> to vector<128x128xf32>
    %21 = arith.mulf %19, %20 : vector<128x128xf32>
    %22 = arith.addf %16, %21 : vector<128x128xf32>
    %23 = vector.extract_strided_slice %5 {offsets = [0, 3], sizes = [128, 1], strides = [1, 1]} : vector<128x4xf32> to vector<128x1xf32>
    %24 = vector.extract_strided_slice %4 {offsets = [3, 0], sizes = [1, 128], strides = [1, 1]} : vector<4x128xf32> to vector<1x128xf32>
    %25 = vector.broadcast %23 : vector<128x1xf32> to vector<128x128xf32>
    %26 = vector.broadcast %24 : vector<1x128xf32> to vector<128x128xf32>
    %27 = arith.mulf %25, %26 : vector<128x128xf32>
    %28 = arith.addf %22, %27 : vector<128x128xf32>
    %c0_5 = arith.constant 0 : index
    %c0_6 = arith.constant 0 : index
    %29 = vector.load %arg4[%c0_5, %c0_6] : memref<128x1xf32, #tpu.memory_space<vmem>>, vector<128x1xf32>
    %30 = vector.broadcast %29 : vector<128x1xf32> to vector<128x128xf32>
    %31 = arith.addf %28, %30 : vector<128x128xf32>
    %cst = arith.constant 0.000000e+00 : f32
    %32 = vector.broadcast %cst : f32 to vector<128x128xf32>
    %33 = arith.maximumf %31, %32 : vector<128x128xf32>
    %c0_7 = arith.constant 0 : index
    %c0_8 = arith.constant 0 : index
    %34 = vector.load %arg9[%c0_7, %c0_8] : memref<128x1xf32, #tpu.memory_space<vmem>>, vector<128x1xf32>
    %cst_9 = arith.constant dense<0.000000e+00> : vector<128xf32>
    %35 = vector.multi_reduction <add>, %33, %cst_9 [1] : vector<128x128xf32> to vector<128xf32>
    %36 = vector.shape_cast %35 : vector<128xf32> to vector<128x1xf32>
    %37 = arith.addf %34, %36 : vector<128x1xf32>
    %c0_10 = arith.constant 0 : index
    %c0_11 = arith.constant 0 : index
    %38 = vector.load %arg9[%c0_10, %c0_11] : memref<128x1xf32, #tpu.memory_space<vmem>>, vector<128x1xf32>
    tpu.vector_store %arg9[%c0_10, %c0_11], %37 {strides = array<i32>} : memref<128x1xf32, #tpu.memory_space<vmem>>, vector<128x1xf32>,
    %c1_i32 = arith.constant 1 : i32
    %39 = arith.cmpi eq, %arg1, %c1_i32 : i32
    %40 = arith.extui %39 : i1 to i32
    %c0_i32_12 = arith.constant 0 : i32
    %41 = arith.cmpi ne, %40, %c0_i32_12 : i32
    scf.if %41 {
      %c0_13 = arith.constant 0 : index
      %c0_14 = arith.constant 0 : index
      %42 = vector.load %arg9[%c0_13, %c0_14] : memref<128x1xf32, #tpu.memory_space<vmem>>, vector<128x1xf32>
      %cst_15 = arith.constant 3.906250e-03 : f32
      %43 = vector.broadcast %cst_15 : f32 to vector<128x1xf32>
      %44 = arith.mulf %42, %43 : vector<128x1xf32>
      %45 = tpu.iota {dimensions = array<i32: 0>} : vector<128x128xi32>
      %46 = tpu.iota {dimensions = array<i32: 1>} : vector<128x128xi32>
      %47 = arith.cmpi eq, %45, %46 : vector<128x128xi32>
      %cst_16 = arith.constant 0.000000e+00 : f32
      %48 = vector.shape_cast %44 : vector<128x1xf32> to vector<128x1xf32>
      %49 = vector.broadcast %48 : vector<128x1xf32> to vector<128x128xf32>
      %50 = vector.broadcast %cst_16 : f32 to vector<128x128xf32>
      %51 = arith.select %47, %49, %50 : vector<128x128xi1>, vector<128x128xf32>
      %cst_17 = arith.constant dense<0.000000e+00> : vector<128xf32>
      %52 = vector.multi_reduction <add>, %51, %cst_17 [0] : vector<128x128xf32> to vector<128xf32>
      %53 = vector.shape_cast %52 : vector<128xf32> to vector<1x128xf32>
      %c0_18 = arith.constant 0 : index
      %c0_19 = arith.constant 0 : index
      %c0_20 = arith.constant 0 : index
      %54 = vector.load %arg7[%c0_18, %c0_19, %c0_20] : memref<1x1x128xf32, #tpu.memory_space<vmem>>, vector<1x1x128xf32>
      %55 = vector.shape_cast %54 : vector<1x1x128xf32> to vector<1x128xf32>
      %56 = vector.shape_cast %53 : vector<1x128xf32> to vector<1x1x128xf32>
      tpu.vector_store %arg7[%c0_18, %c0_19, %c0_20], %56 {strides = array<i32>} : memref<1x1x128xf32, #tpu.memory_space<vmem>>, vector<1x1x128xf32>,
      %c0_21 = arith.constant 0 : index
      %c0_22 = arith.constant 0 : index
      %57 = vector.load %arg5[%c0_21, %c0_22] : memref<128x128xf32, #tpu.memory_space<vmem>>, vector<128x128xf32>
      %cst_23 = arith.constant dense<0.000000e+00> : vector<1x128xf32>
      %58 = tpu.matmul %53, %57, %cst_23 {dimension_numbers = #tpu.dot_dimension_numbers<[1], [0], [0], [1], [0, 0, 1, 1], [], []>, precision = #tpu.contract_precision<fp32>} : vector<1x128xf32>, vector<128x128xf32>, vector<1x128xf32> -> vector<1x128xf32>
      %c0_24 = arith.constant 0 : index
      %c0_25 = arith.constant 0 : index
      %59 = vector.load %arg6[%c0_24, %c0_25] : memref<1x128xf32, #tpu.memory_space<vmem>>, vector<1x128xf32>
      %60 = arith.addf %58, %59 : vector<1x128xf32>
      %c0_26 = arith.constant 0 : index
      %c0_27 = arith.constant 0 : index
      %c0_28 = arith.constant 0 : index
      %61 = vector.load %arg8[%c0_26, %c0_27, %c0_28] : memref<1x1x128xf32, #tpu.memory_space<vmem>>, vector<1x1x128xf32>
      %62 = vector.shape_cast %61 : vector<1x1x128xf32> to vector<1x128xf32>
      %63 = vector.shape_cast %60 : vector<1x128xf32> to vector<1x1x128xf32>
      tpu.vector_store %arg8[%c0_26, %c0_27, %c0_28], %63 {strides = array<i32>} : memref<1x1x128xf32, #tpu.memory_space<vmem>>, vector<1x1x128xf32>,
    } else {
    }
    return
  }
  func.func @transform_0(%arg0: i32, %arg1: i32) -> (i32, i32, i32) {
    %c0_i32 = arith.constant 0 : i32
    %c0_i32_0 = arith.constant 0 : i32
    return %arg0, %c0_i32, %arg1 : i32, i32, i32
  }
  func.func @transform_1(%arg0: i32, %arg1: i32) -> (i32, i32) {
    %c0_i32 = arith.constant 0 : i32
    %c0_i32_0 = arith.constant 0 : i32
    %c0_i32_1 = arith.constant 0 : i32
    return %c0_i32, %c0_i32_0 : i32, i32
  }
  func.func @transform_2(%arg0: i32, %arg1: i32) -> (i32, i32) {
    %c0_i32 = arith.constant 0 : i32
    %c0_i32_0 = arith.constant 0 : i32
    %c0_i32_1 = arith.constant 0 : i32
    return %c0_i32, %c0_i32_0 : i32, i32
  }
  func.func @transform_3(%arg0: i32, %arg1: i32) -> (i32, i32) {
    %c0_i32 = arith.constant 0 : i32
    %c0_i32_0 = arith.constant 0 : i32
    %c0_i32_1 = arith.constant 0 : i32
    return %c0_i32, %c0_i32_0 : i32, i32
  }
  func.func @transform_4(%arg0: i32, %arg1: i32) -> (i32, i32) {
    %c0_i32 = arith.constant 0 : i32
    %c0_i32_0 = arith.constant 0 : i32
    %c0_i32_1 = arith.constant 0 : i32
    return %c0_i32, %c0_i32_0 : i32, i32
  }
  func.func @transform_5(%arg0: i32, %arg1: i32) -> (i32, i32, i32) {
    %c0_i32 = arith.constant 0 : i32
    %c0_i32_0 = arith.constant 0 : i32
    %c0_i32_1 = arith.constant 0 : i32
    return %arg0, %c0_i32, %c0_i32_0 : i32, i32, i32
  }
  func.func @transform_6(%arg0: i32, %arg1: i32) -> (i32, i32, i32) {
    %c0_i32 = arith.constant 0 : i32
    %c0_i32_0 = arith.constant 0 : i32
    %c0_i32_1 = arith.constant 0 : i32
    return %arg0, %c0_i32, %c0_i32_0 : i32, i32, i32
  }
}

</mosaic_0001>

<bundles_post_ra>
// kernel: tpu_custom_call.1
= control target key start
LH: loop header
LB: loop body
LE: loop exit
PB: predicated region body
PF: predicated region fallthrough
CT: control target
= control target key end

     0   :  { %s3505_s0 = inlined_call_operand.vmem [shape: f32[2,4,256], index: 0, kind: input, shape index: {}]   ;;  %s3506_s1 = inlined_call_operand.vmem [shape: f32[128,4], index: 1, kind: input, shape index: {}]   ;;  %s3507_s2 = inlined_call_operand.vmem [shape: f32[128,1], index: 2, kind: input, shape index: {}]   ;;  %s3508_s3 = inlined_call_operand.vmem [shape: f32[128,128], index: 3, kind: input, shape index: {}]   ;;  %s3509_s4 = inlined_call_operand.vmem [shape: f32[1,128], index: 4, kind: input, shape index: {}]   ;;  %s3510_s5 = inlined_call_operand.hbm [shape: f32[2,1,128], index: 5, kind: output, shape index: {0}]   ;;  %s3511_s6 = inlined_call_operand.hbm [shape: f32[2,1,128], index: 6, kind: output, shape index: {1}]  }
   0x1   :  { %3513 = sst [smem:[#allocation9_spill]] %s3505_s0 }
   0x2   :  { %3514 = sst [smem:[#allocation10_spill]] %s3506_s1 }
   0x3   :  { %3515 = sst [smem:[#allocation11_spill]] %s3507_s2 }
   0x4   :  { %12 = vsyncpa [#allocation4], 0 }
   0x5   :  { %14 = vsyncpa [#allocation4 + $0x1], 0 }
   0x6   :  { %15 = vsyncpa [#allocation6], 0 }
   0x7   :  { %17 = vsyncpa [#allocation6 + $0x1], 0  ;;  %s2656_s21 = smov 0   ;;  %s2658_s22 = smov 0  }
   0x8   :  { %s2660_s23 = smov 0   ;;  %s2662_s24 = smov 0  }
   0x9   :  { %s2664_s25 = smov 0   ;;  %s2666_s26 = smov 0  }
   0xa   :  { %s2668_s27 = smov 0   ;;  %s2670_s28 = smov 0  }
   0xb LB: > { %s1907_s29 = sadd.s32 4294967295, %s2608_s28   ;;  %s1908_s30 = sadd.s32 4294967294, %s2608_s28   ;;  %s2608_s28 = sphi %s2670_s28, %s23_s28   ;;  %s2604_s27 = sphi %s2668_s27, %s3537_s27   ;;  %s2600_s26 = sphi %s2666_s26, %s3536_s26   ;;  %s2596_s25 = sphi %s2664_s25, %s3535_s25   ;;  %s2592_s24 = sphi %s2662_s24, %s3534_s24   ;;  %s2588_s23 = sphi %s2660_s23, %s3533_s23   ;;  %s2584_s22 = sphi %s2658_s22, %s3532_s22   ;;  %s2580_s21 = sphi %s2656_s21, %s3531_s21  }
   0xc   : > { %s32_s7 = sadd.s32 1, %s2600_s26  ;;  %s35_s8 = sadd.s32 1, %s2604_s27 }
   0xd   : > { %p33_p0 = scmp.ge.s32.totalorder %s32_s7, 2  ;;  %p164_p1 = scmp.ne.s32.totalorder %s2588_s23, %s2584_s22 }
   0xe   : > { %p165_p2 = scmp.eq.s32.totalorder %s1907_s29, 3  ;;  %p170_p4 = scmp.ne.s32.totalorder %s2584_s22, %s2580_s21 }
   0xf   : > { %s3539_s7 = smov (%p33_p0, %s32_s7), 0  ;;  %s3541_s8 = smov (!%p33_p0, %s35_s8), %s2604_s27 }
  0x10   : > { %p2705_p3 = por %p165_p2, %p164_p1  ;;  %p37_p5 = scmp.ge.s32.totalorder %s3541_s8, 2 }
  0x11   : > { %p171_p6 = scmp.eq.s32.totalorder %s1908_s30, 3  ;;  %p1911_p7 = scmp.ge.s32.totalorder %s2608_s28, 1 }
  0x12   : > { %p238_p8 = scmp.lt.s32.totalorder %s2608_s28, 5  ;;  %s3543_s8 = smov (%p37_p5, %s3541_s8), 0 }
  0x13   : > { %p2715_p9 = por %p171_p6, %p170_p4  ;;  %s151_s11 = ssub.s32 %s2604_s27, %s3543_s8 }
  0x14   : > { %p239_p10 = pnand %p1911_p7, %p238_p8  ;;  %s154_s12 = sadd.s32 1, %s2588_s23 }
  0x15   : > { %p152_p11 = scmp.eq.s32.totalorder %s151_s11, 0  ;;  %s2726_s14 = sand.u32 (!%p239_p10), 1, %s2584_s22  }
  0x16   : > { %242 = sbr.rel (%p239_p10) target bundleno = 984 (0x3d8), region = 40  ;;  %p274_p12 = scmp.lt.s32.totalorder (!%p239_p10), %s2596_s25, 1 }
  0x17   : > { %s2723_s13 = scalar_select %p152_p11, %s2588_s23, %s154_s12  }
  0x18   : > { %p276_p13 = scmp.lt.s32.totalorder (!%p239_p10), %s2592_s24, 1  ;;  %s3518_s0 = sld [smem:[#allocation9_spill]] (!%p239_p10) }
  0x19   : > { %s267_s11 = scalar_lea.vmem (!%p239_p10), [#allocation3], %s2726_s14  ;;  %p1914_p0 = scmp.ne.s32.totalorder (!%p239_p10), %s2592_s24, 0 }
  0x1d   : > { %s275_s15 = scalar_select %p274_p12, %s2596_s25, 1 }
  0x1e   : > { %s277_s17 = scalar_select %p276_p13, %s2592_s24, 1 }
  0x1f   : > { %s1912_s16 = sshll.u32 %s275_s15, 1  ;;  %285 = sbr.rel (%p1914_p0) target bundleno = 40 (0x28), region = 44  ;;  %vm286_vm0 = vcmask (!%p1914_p0), 7168   ;;  %v2610_v0 = vmov (!%p1914_p0), 0.0  }
  0x20   : > { %s279_s18 = sadd.s32 %s1912_s16, %s277_s17  ;;  %287 = vst.msk [vmem:[#allocation2] sm:$0xff] (!%p1914_p0), %vm286_vm0, %v2610_v0  ;;  %288 = vst.msk [vmem:[#allocation2 + $0x8] sm:$0xff] (!%p1914_p0), %vm286_vm0, %v2610_v0 }
  0x21   : > { %s1913_s19 = sshll.u32 %s279_s18, 2  ;;  %289 = vst.msk [vmem:[#allocation2 + $0x10] sm:$0xff] (!%p1914_p0), %vm286_vm0, %v2610_v0  ;;  %290 = vst.msk [vmem:[#allocation2 + $0x18] sm:$0xff] (!%p1914_p0), %vm286_vm0, %v2610_v0 }
  0x22   : > { %s2735_s30 = scalar_lea.vmem %s3518_s0, %s1913_s19  ;;  %291 = vst.msk [vmem:[#allocation2 + $0x20] sm:$0xff] (!%p1914_p0), %vm286_vm0, %v2610_v0  ;;  %292 = vst.msk [vmem:[#allocation2 + $0x28] sm:$0xff] (!%p1914_p0), %vm286_vm0, %v2610_v0 }
  0x23   : > { %293 = vst.msk [vmem:[#allocation2 + $0x30] sm:$0xff] (!%p1914_p0), %vm286_vm0, %v2610_v0  ;;  %294 = vst.msk [vmem:[#allocation2 + $0x38] sm:$0xff] (!%p1914_p0), %vm286_vm0, %v2610_v0 }
  0x24   : > { %295 = vst.msk [vmem:[#allocation2 + $0x40] sm:$0xff] (!%p1914_p0), %vm286_vm0, %v2610_v0  ;;  %296 = vst.msk [vmem:[#allocation2 + $0x48] sm:$0xff] (!%p1914_p0), %vm286_vm0, %v2610_v0 }
  0x25   : > { %297 = vst.msk [vmem:[#allocation2 + $0x50] sm:$0xff] (!%p1914_p0), %vm286_vm0, %v2610_v0  ;;  %298 = vst.msk [vmem:[#allocation2 + $0x58] sm:$0xff] (!%p1914_p0), %vm286_vm0, %v2610_v0 }
  0x26   : > { %299 = vst.msk [vmem:[#allocation2 + $0x60] sm:$0xff] %vm286_vm0, %v2610_v0  ;;  %300 = vst.msk [vmem:[#allocation2 + $0x68] sm:$0xff] %vm286_vm0, %v2610_v0 }
  0x27   : > { %301 = vst.msk [vmem:[#allocation2 + $0x70] sm:$0xff] %vm286_vm0, %v2610_v0  ;;  %302 = vst.msk [vmem:[#allocation2 + $0x78] sm:$0xff] %vm286_vm0, %v2610_v0 }
  0x28 PF: > { %s3519_s1 = sld [smem:[#allocation10_spill]]  ;;  %v2611_v3 = vmov 1   ;;  %v2612_v4 = vmov 0   ;;  %v2613_v13 = vmov 2   ;;  %v2614_v20 = vmov 3   ;;  %s3520_s2 = sld [smem:[#allocation11_spill]] }
  0x29   : > { %2472 = vset.pattern.permute.xlu0 %v2611_v3  ;;  %2471 = vset.pattern.permute.xlu1 %v2612_v4  ;;  %v400_v21 = vlaneseq  ;;  %v2829_v27 = vld [vmem:[%s2735_s30] sm:$0xf]  ;;  %vm912_vm1 = vcmask 7168   ;;  %p1915_p1 = scmp.ne.s32.totalorder %s2592_s24, 1 }
  0x2a   : > { %vm2617_vm2 = vmmov (!%p1915_p1), 0   ;;  %s3528_s15 = scalar_lea.vmem (!%p1915_p1), [#allocation5], %s2726_s14 }
  0x2b   : > { %v2819_v22 = vshrl.u32 %v400_v21, 7 }
  0x2d   : > { %v486_v24 = vsub.s32 1, %v2819_v22  ;;  %v402_v25 = vsub.s32 0, %v2819_v22 }
  0x2e   : > { %v2759_v1 = vld [vmem:[%s3519_s1 + $0x10] sm:$0xff]  ;;  %v2764_v2 = vld [vmem:[%s3519_s1] sm:$0xff]  ;;  %v307_v5 = vld [vmem:[%s3519_s1 + $0x18] sm:$0xff] }
  0x2f   : > { %332 = vperm.xlu1 %2471, %v2759_v1   ;;  %421 = vperm.xlu0 %2472, %v2764_v2   ;;  %v309_v6 = vld [vmem:[%s3519_s1 + $0x28] sm:$0xff]  ;;  %v311_v7 = vld [vmem:[%s3519_s1 + $0x38] sm:$0xff]  ;;  %v308_v14 = vld [vmem:[%s3519_s1 + $0x20] sm:$0xff]  ;;  %v2834_v29 = vrot.slane %v2829_v27, %v486_v24  ;;  %v2840_v31 = vrot.slane %v2829_v27, %v402_v25 }
  0x30   : > { %v313_v8 = vld [vmem:[%s3519_s1 + $0x48] sm:$0xff]  ;;  %v315_v9 = vld [vmem:[%s3519_s1 + $0x58] sm:$0xff]  ;;  %v310_v15 = vld [vmem:[%s3519_s1 + $0x30] sm:$0xff] }
  0x31   : > { %v317_v10 = vld [vmem:[%s3519_s1 + $0x68] sm:$0xff]  ;;  %v319_v11 = vld [vmem:[%s3519_s1 + $0x78] sm:$0xff]  ;;  %v312_v16 = vld [vmem:[%s3519_s1 + $0x40] sm:$0xff] }
  0x32   : > { %v305_v12 = vld [vmem:[%s3519_s1 + $0x8] sm:$0xff]  ;;  %v314_v17 = vld [vmem:[%s3519_s1 + $0x50] sm:$0xff]  ;;  %v316_v18 = vld [vmem:[%s3519_s1 + $0x60] sm:$0xff] }
  0x33   : > { %337 = vperm.xlu1 %2471, %v307_v5   ;;  %433 = vperm.xlu0 %2472, %v307_v5   ;;  %v318_v19 = vld [vmem:[%s3519_s1 + $0x70] sm:$0xff]  ;;  %v721_v23 = vld [vmem:[%s3520_s2 + $0x8] sm:$0xff]  ;;  %v724_v30 = vld [vmem:[%s3520_s2 + $0x20] sm:$0xff] }
  0x34   : > { %v726_v36 = vld [vmem:[%s3520_s2 + $0x30] sm:$0xff]  ;;  %v720_v37 = vld [vmem:[%s3520_s2] sm:$0xff]  ;;  %v723_v51 = vld [vmem:[%s3520_s2 + $0x18] sm:$0xff] }
  0x35   : > { %v728_v43 = vld [vmem:[%s3520_s2 + $0x40] sm:$0xff]  ;;  %v722_v44 = vld [vmem:[%s3520_s2 + $0x10] sm:$0xff]  ;;  %v725_v58 = vld [vmem:[%s3520_s2 + $0x28] sm:$0xff] }
  0x36   : > { %v730_v50 = vld [vmem:[%s3520_s2 + $0x50] sm:$0xff]  ;;  %v732_v57 = vld [vmem:[%s3520_s2 + $0x60] sm:$0xff]  ;;  %v735_v24 = vld [vmem:[%s3520_s2 + $0x78] sm:$0xff] }
  0x37   : > { %347 = vperm.xlu1 %2471, %v309_v6   ;;  %441 = vperm.xlu0 %2472, %v309_v6   ;;  %v734_v0 = vld [vmem:[%s3520_s2 + $0x70] sm:$0xff] }
  0x3b   : > { %357 = vperm.xlu1 %2471, %v311_v7   ;;  %449 = vperm.xlu0 %2472, %v311_v7  }
  0x3f   : > { %367 = vperm.xlu1 %2471, %v313_v8   ;;  %457 = vperm.xlu0 %2472, %v313_v8  }
  0x43   : > { %377 = vperm.xlu1 %2471, %v315_v9   ;;  %465 = vperm.xlu0 %2472, %v315_v9  }
  0x47   : > { %387 = vperm.xlu1 %2471, %v317_v10   ;;  %473 = vperm.xlu0 %2472, %v317_v10  }
  0x4b   : > { %397 = vperm.xlu1 %2471, %v319_v11   ;;  %481 = vperm.xlu0 %2472, %v319_v11  }
  0x4f   : > { %2473 = vset.pattern.permute.xlu1 %v2611_v3  ;;  %2475 = vset.pattern.permute.xlu0 %v2613_v13 }
  0x50   : > { %425 = vperm.xlu1 %2473, %v305_v12   ;;  %525 = vperm.xlu0 %2475, %v305_v12  }
  0x54   : > { %429 = vperm.xlu1 %2473, %v2759_v1   ;;  %537 = vperm.xlu0 %2475, %v308_v14  }
  0x58   : > { %437 = vperm.xlu1 %2473, %v308_v14   ;;  %545 = vperm.xlu0 %2475, %v310_v15  }
  0x5c   : > { %445 = vperm.xlu1 %2473, %v310_v15   ;;  %553 = vperm.xlu0 %2475, %v312_v16  }
  0x60   : > { %453 = vperm.xlu1 %2473, %v312_v16   ;;  %561 = vperm.xlu0 %2475, %v314_v17  }
  0x64   : > { %461 = vperm.xlu1 %2473, %v314_v17   ;;  %569 = vperm.xlu0 %2475, %v316_v18  }
  0x68   : > { %469 = vperm.xlu1 %2473, %v316_v18   ;;  %577 = vperm.xlu0 %2475, %v318_v19  }
  0x6c   : > { %477 = vperm.xlu1 %2473, %v318_v19   ;;  %2476 = vset.pattern.permute.xlu0 %v2614_v20 }
  0x6d   : > { %621 = vperm.xlu0 %2476, %v2764_v2  }
  0x70   : > { %2474 = vset.pattern.permute.xlu1 %v2613_v13  ;;  %v731_v13 = vld [vmem:[%s3520_s2 + $0x58] sm:$0xff] }
  0x71   : > { %521 = vperm.xlu1 %2474, %v2764_v2   ;;  %633 = vperm.xlu0 %2476, %v307_v5  }
  0x75   : > { %529 = vperm.xlu1 %2474, %v2759_v1   ;;  %641 = vperm.xlu0 %2476, %v309_v6  }
  0x79   : > { %533 = vperm.xlu1 %2474, %v307_v5   ;;  %649 = vperm.xlu0 %2476, %v311_v7  }
  0x7d   : > { %541 = vperm.xlu1 %2474, %v309_v6   ;;  %657 = vperm.xlu0 %2476, %v313_v8  }
  0x81   : > { %549 = vperm.xlu1 %2474, %v311_v7   ;;  %665 = vperm.xlu0 %2476, %v315_v9   ;;  %v729_v7 = vld [vmem:[%s3520_s2 + $0x48] sm:$0xff] }
  0x85   : > { %557 = vperm.xlu1 %2474, %v313_v8   ;;  %673 = vperm.xlu0 %2476, %v317_v10  }
  0x89   : > { %565 = vperm.xlu1 %2474, %v315_v9   ;;  %681 = vperm.xlu0 %2476, %v319_v11  }
  0x8d   : > { %573 = vperm.xlu1 %2474, %v317_v10   ;;  %2478 = vset.pattern.permute.xlu0 %v2612_v4 }
  0x8e   : > { %322 = vperm.xlu0 %2478, %v2764_v2  }
  0x91   : > { %581 = vperm.xlu1 %2474, %v319_v11  }
  0x92   : > { %327 = vperm.xlu0 %2478, %v305_v12  }
  0x95   : > { %2477 = vset.pattern.permute.xlu1 %v2614_v20 }
  0x96   : > { %625 = vperm.xlu1 %2477, %v305_v12   ;;  %342 = vperm.xlu0 %2478, %v308_v14  }
  0x9a   : > { %629 = vperm.xlu1 %2477, %v2759_v1   ;;  %352 = vperm.xlu0 %2478, %v310_v15   ;;  %v727_v1 = vld [vmem:[%s3520_s2 + $0x38] sm:$0xff] }
  0x9e   : > { %637 = vperm.xlu1 %2477, %v308_v14   ;;  %362 = vperm.xlu0 %2478, %v312_v16  }
  0xa2   : > { %645 = vperm.xlu1 %2477, %v310_v15   ;;  %372 = vperm.xlu0 %2478, %v314_v17  }
  0xa6   : > { %653 = vperm.xlu1 %2477, %v312_v16   ;;  %382 = vperm.xlu0 %2478, %v316_v18  }
  0xaa   : > { %661 = vperm.xlu1 %2477, %v314_v17   ;;  %392 = vperm.xlu0 %2478, %v318_v19   ;;  %v733_v17 = vld [vmem:[%s3520_s2 + $0x68] sm:$0xff] }
  0xae   : > { %v2826_v26 = vpop.permute.xlu1 %332  ;;  %669 = vperm.xlu1 %2477, %v316_v18   ;;  %743 = vperm.xlu0 %2478, %v721_v23   ;;  %v2831_v28 = vpop.permute.xlu0 %421 }
  0xaf   : > { %v406_v20 = vmul.f32 %v2840_v31, %v2826_v26 }
  0xb2   : > { %v338_v32 = vpop.permute.xlu1 %337  ;;  %677 = vperm.xlu1 %2477, %v318_v19   ;;  %758 = vperm.xlu0 %2478, %v724_v30   ;;  %v434_v33 = vpop.permute.xlu0 %433 }
  0xb3   : > { %v407_v34 = vmul.f32 %v2840_v31, %v338_v32  ;;  %v491_v35 = vmul.f32 %v2834_v29, %v434_v33 }
  0xb5   : > { %v2850_v38 = vadd.f32 %v491_v35, %v407_v34 }
  0xb6   : > { %v348_v39 = vpop.permute.xlu1 %347  ;;  %2479 = vset.pattern.permute.xlu1 %v2612_v4  ;;  %768 = vperm.xlu0 %2478, %v726_v36   ;;  %v442_v40 = vpop.permute.xlu0 %441 }
  0xb7   : > { %v409_v41 = vmul.f32 %v2840_v31, %v348_v39  ;;  %v493_v42 = vmul.f32 %v2834_v29, %v442_v40  ;;  %738 = vperm.xlu1 %2479, %v720_v37  }
  0xb9   : > { %v2861_v45 = vadd.f32 %v493_v42, %v409_v41 }
  0xba   : > { %v358_v46 = vpop.permute.xlu1 %357  ;;  %778 = vperm.xlu0 %2478, %v728_v43   ;;  %v450_v47 = vpop.permute.xlu0 %449 }
  0xbb   : > { %v411_v48 = vmul.f32 %v2840_v31, %v358_v46  ;;  %v495_v49 = vmul.f32 %v2834_v29, %v450_v47  ;;  %748 = vperm.xlu1 %2479, %v722_v44   ;;  %v686_v46 = vsub.s32 3, %v2819_v22  ;;  %v586_v47 = vsub.s32 2, %v2819_v22 }
  0xbd   : > { %v2871_v52 = vadd.f32 %v495_v49, %v411_v48 }
  0xbe   : > { %v368_v53 = vpop.permute.xlu1 %367  ;;  %788 = vperm.xlu0 %2478, %v730_v50   ;;  %v458_v54 = vpop.permute.xlu0 %457  ;;  %v2951_v50 = vrot.slane %v2829_v27, %v686_v46 }
  0xbf   : > { %v413_v55 = vmul.f32 %v2840_v31, %v368_v53  ;;  %v497_v56 = vmul.f32 %v2834_v29, %v458_v54  ;;  %753 = vperm.xlu1 %2479, %v723_v51   ;;  %v2954_v51 = vrot.slane %v2829_v27, %v586_v47  ;;  %v488_v47 = vmul.f32 %v2834_v29, %v2831_v28 }
  0xc1   : > { %v2881_v59 = vadd.f32 %v497_v56, %v413_v55 }
  0xc2   : > { %v378_v60 = vpop.permute.xlu1 %377  ;;  %798 = vperm.xlu0 %2478, %v732_v57   ;;  %v466_v61 = vpop.permute.xlu0 %465 }
  0xc3   : > { %v415_v62 = vmul.f32 %v2840_v31, %v378_v60  ;;  %v499_v63 = vmul.f32 %v2834_v29, %v466_v61  ;;  %763 = vperm.xlu1 %2479, %v725_v58  }
  0xc5   : > { %v2891_v2 = vadd.f32 %v499_v63, %v415_v62 }
  0xc6   : > { %v388_v3 = vpop.permute.xlu1 %387  ;;  %808 = vperm.xlu0 %2478, %v734_v0   ;;  %v474_v4 = vpop.permute.xlu0 %473 }
  0xc7   : > { %v417_v5 = vmul.f32 %v2840_v31, %v388_v3  ;;  %v501_v6 = vmul.f32 %v2834_v29, %v474_v4  ;;  %773 = vperm.xlu1 %2479, %v727_v1  }
  0xc9   : > { %v2898_v8 = vadd.f32 %v501_v6, %v417_v5 }
  0xca   : > { %v398_v9 = vpop.permute.xlu1 %397  ;;  %v482_v10 = vpop.permute.xlu0 %481 }
  0xcb   : > { %v419_v11 = vmul.f32 %v2840_v31, %v398_v9  ;;  %v503_v12 = vmul.f32 %v2834_v29, %v482_v10  ;;  %783 = vperm.xlu1 %2479, %v729_v7  }
  0xcd   : > { %v2905_v14 = vadd.f32 %v503_v12, %v419_v11 }
  0xcf   : > { %v2907_v15 = vpop.permute.xlu1 %425  ;;  %793 = vperm.xlu1 %2479, %v731_v13   ;;  %v2909_v16 = vpop.permute.xlu0 %525 }
  0xd3   : > { %v430_v18 = vpop.permute.xlu1 %429  ;;  %803 = vperm.xlu1 %2479, %v733_v17   ;;  %v2914_v19 = vpop.permute.xlu0 %537 }
  0xd4   : > { %v490_v23 = vmul.f32 %v2834_v29, %v430_v18 }
  0xd6   : > { %v2922_v25 = vadd.f32 %v490_v23, %v406_v20 }
  0xd7   : > { %v2924_v30 = vpop.permute.xlu1 %437  ;;  %813 = vperm.xlu1 %2479, %v735_v24   ;;  %v2926_v32 = vpop.permute.xlu0 %545 }
  0xdb   : > { %v2928_v33 = vpop.permute.xlu1 %445  ;;  %v2930_v34 = vpop.permute.xlu0 %553 }
  0xdf   : > { %v2932_v35 = vpop.permute.xlu1 %453  ;;  %v2934_v26 = vpop.permute.xlu0 %561 }
  0xe3   : > { %v2936_v36 = vpop.permute.xlu1 %461  ;;  %v2938_v37 = vpop.permute.xlu0 %569 }
  0xe7   : > { %v2940_v39 = vpop.permute.xlu1 %469  ;;  %v2942_v40 = vpop.permute.xlu0 %577 }
  0xeb   : > { %v2944_v41 = vpop.permute.xlu1 %477 }
  0xec   : > { %v622_v42 = vpop.permute.xlu0 %621 }
  0xed   : > { %v688_v28 = vmul.f32 %v2951_v50, %v622_v42 }
  0xf0   : > { %v522_v43 = vpop.permute.xlu1 %521  ;;  %v634_v44 = vpop.permute.xlu0 %633 }
  0xf1   : > { %v691_v55 = vmul.f32 %v2951_v50, %v634_v44 }
  0xf4   : > { %v2948_v48 = vpop.permute.xlu1 %529  ;;  %v642_v49 = vpop.permute.xlu0 %641 }
  0xf5   : > { %v693_v61 = vmul.f32 %v2951_v50, %v642_v49 }
  0xf8   : > { %v534_v53 = vpop.permute.xlu1 %533  ;;  %v650_v54 = vpop.permute.xlu0 %649 }
  0xf9   : > { %v591_v56 = vmul.f32 %v2954_v51, %v534_v53  ;;  %v695_v5 = vmul.f32 %v2951_v50, %v650_v54  ;;  %v588_v54 = vmul.f32 %v2954_v51, %v522_v43  ;;  %v589_v43 = vmul.f32 %v2954_v51, %v2909_v16 }
  0xfa   : > { %v494_v16 = vmul.f32 %v2834_v29, %v2928_v33 }
  0xfb   : > { %v607_v57 = vadd.f32 %v591_v56, %v2850_v38 }
  0xfc   : > { %v542_v58 = vpop.permute.xlu1 %541  ;;  %v658_v60 = vpop.permute.xlu0 %657 }
  0xfd   : > { %v593_v62 = vmul.f32 %v2954_v51, %v542_v58  ;;  %v2961_v63 = vadd.f32 %v691_v55, %v607_v57  ;;  %v697_v11 = vmul.f32 %v2951_v50, %v658_v60  ;;  %v489_v60 = vmul.f32 %v2834_v29, %v2907_v15 }
  0xfe   : > { %v492_v15 = vmul.f32 %v2834_v29, %v2924_v30 }
  0xff   : > { %v609_v0 = vadd.f32 %v593_v62, %v2861_v45 }
 0x100   : > { %v550_v27 = vpop.permute.xlu1 %549  ;;  %v666_v1 = vpop.permute.xlu0 %665 }
 0x101   : > { %v595_v3 = vmul.f32 %v2954_v51, %v550_v27  ;;  %v2965_v4 = vadd.f32 %v693_v61, %v609_v0  ;;  %v699_v20 = vmul.f32 %v2951_v50, %v666_v1 }
 0x103   : > { %v611_v38 = vadd.f32 %v595_v3, %v2871_v52 }
 0x104   : > { %v558_v6 = vpop.permute.xlu1 %557  ;;  %v674_v7 = vpop.permute.xlu0 %673 }
 0x105   : > { %v597_v9 = vmul.f32 %v2954_v51, %v558_v6  ;;  %v2970_v10 = vadd.f32 %v695_v5, %v611_v38  ;;  %v701_v49 = vmul.f32 %v2951_v50, %v674_v7  ;;  %v592_v7 = vmul.f32 %v2954_v51, %v2914_v19 }
 0x107   : > { %v613_v45 = vadd.f32 %v597_v9, %v2881_v59 }
 0x108   : > { %v566_v12 = vpop.permute.xlu1 %565  ;;  %v682_v13 = vpop.permute.xlu0 %681 }
 0x109   : > { %v599_v17 = vmul.f32 %v2954_v51, %v566_v12  ;;  %v2975_v18 = vadd.f32 %v697_v11, %v613_v45  ;;  %v703_v0 = vmul.f32 %v2951_v50, %v682_v13  ;;  %v594_v13 = vmul.f32 %v2954_v51, %v2926_v32 }
 0x10b   : > { %v615_v52 = vadd.f32 %v599_v17, %v2891_v2 }
 0x10c   : > { %v574_v23 = vpop.permute.xlu1 %573 }
 0x10d   : > { %v601_v24 = vmul.f32 %v2954_v51, %v574_v23  ;;  %v323_v44 = vpop.permute.xlu0 %322  ;;  %v2980_v46 = vadd.f32 %v699_v20, %v615_v52  ;;  %v496_v52 = vmul.f32 %v2834_v29, %v2932_v35 }
 0x10e   : > { %v404_v59 = vmul.f32 %v2840_v31, %v323_v44 }
 0x10f   : > { %v617_v53 = vadd.f32 %v601_v24, %v2898_v8  ;;  %v596_v24 = vmul.f32 %v2954_v51, %v2930_v34 }
 0x110   : > { %v504_v55 = vadd.f32 %v488_v47, %v404_v59  ;;  %v582_v56 = vpop.permute.xlu1 %581  ;;  %v498_v59 = vmul.f32 %v2834_v29, %v2936_v36 }
 0x111   : > { %v603_v2 = vmul.f32 %v2954_v51, %v582_v56  ;;  %v328_v57 = vpop.permute.xlu0 %327  ;;  %v2989_v58 = vadd.f32 %v701_v49, %v617_v53  ;;  %v598_v53 = vmul.f32 %v2954_v51, %v2934_v26  ;;  %v500_v56 = vmul.f32 %v2834_v29, %v2940_v39 }
 0x112   : > { %v405_v61 = vmul.f32 %v2840_v31, %v328_v57  ;;  %v604_v62 = vadd.f32 %v588_v54, %v504_v55  ;;  %v600_v57 = vmul.f32 %v2954_v51, %v2938_v37  ;;  %v502_v26 = vmul.f32 %v2834_v29, %v2944_v41 }
 0x113   : > { %v619_v8 = vadd.f32 %v603_v2, %v2905_v14  ;;  %v602_v39 = vmul.f32 %v2954_v51, %v2942_v40 }
 0x114   : > { %v505_v27 = vadd.f32 %v489_v60, %v405_v61  ;;  %v2999_v1 = vadd.f32 %v688_v28, %v604_v62 }
 0x115   : > { %v626_v3 = vpop.permute.xlu1 %625  ;;  %v343_v5 = vpop.permute.xlu0 %342  ;;  %v3001_v38 = vadd.f32 %v703_v0, %v619_v8 }
 0x116   : > { %v408_v42 = vmul.f32 %v2840_v31, %v343_v5  ;;  %v605_v6 = vadd.f32 %v589_v43, %v505_v27  ;;  %v689_v36 = vmul.f32 %v2951_v50, %v626_v3 }
 0x118   : > { %v508_v14 = vadd.f32 %v492_v15, %v408_v42  ;;  %v705_v27 = vadd.f32 %v689_v36, %v605_v6 }
 0x119   : > { %v630_v9 = vpop.permute.xlu1 %629  ;;  %v353_v11 = vpop.permute.xlu0 %352 }
 0x11a   : > { %v410_v45 = vmul.f32 %v2840_v31, %v353_v11  ;;  %v608_v12 = vadd.f32 %v592_v7, %v508_v14  ;;  %v690_v6 = vmul.f32 %v2951_v50, %v630_v9 }
 0x11c   : > { %v510_v17 = vadd.f32 %v494_v16, %v410_v45 }
 0x11d   : > { %v638_v30 = vpop.permute.xlu1 %637  ;;  %v363_v20 = vpop.permute.xlu0 %362 }
 0x11e   : > { %v412_v19 = vmul.f32 %v2840_v31, %v363_v20  ;;  %v610_v23 = vadd.f32 %v594_v13, %v510_v17  ;;  %v692_v8 = vmul.f32 %v2951_v50, %v638_v30 }
 0x120   : > { %v512_v44 = vadd.f32 %v496_v52, %v412_v19  ;;  %v708_v14 = vadd.f32 %v692_v8, %v608_v12 }
 0x121   : > { %v646_v33 = vpop.permute.xlu1 %645  ;;  %v373_v47 = vpop.permute.xlu0 %372 }
 0x122   : > { %v414_v32 = vmul.f32 %v2840_v31, %v373_v47  ;;  %v612_v49 = vadd.f32 %v596_v24, %v512_v44  ;;  %v694_v42 = vmul.f32 %v2951_v50, %v646_v33 }
 0x124   : > { %v514_v54 = vadd.f32 %v498_v59, %v414_v32  ;;  %v710_v45 = vadd.f32 %v694_v42, %v610_v23 }
 0x125   : > { %v654_v35 = vpop.permute.xlu1 %653  ;;  %v383_v55 = vpop.permute.xlu0 %382 }
 0x126   : > { %v416_v34 = vmul.f32 %v2840_v31, %v383_v55  ;;  %v614_v2 = vadd.f32 %v598_v53, %v514_v54  ;;  %v696_v40 = vmul.f32 %v2951_v50, %v654_v35 }
 0x128   : > { %v516_v60 = vadd.f32 %v500_v56, %v416_v34  ;;  %v712_v24 = vadd.f32 %v696_v40, %v612_v49 }
 0x129   : > { %v662_v28 = vpop.permute.xlu1 %661  ;;  %v393_v61 = vpop.permute.xlu0 %392 }
 0x12a   : > { %v418_v62 = vmul.f32 %v2840_v31, %v393_v61  ;;  %v616_v0 = vadd.f32 %v600_v57, %v516_v60  ;;  %v590_v31 = vmul.f32 %v2954_v51, %v2948_v48  ;;  %v698_v52 = vmul.f32 %v2951_v50, %v662_v28 }
 0x12c   : > { %v518_v43 = vadd.f32 %v502_v26, %v418_v62  ;;  %v606_v20 = vadd.f32 %v590_v31, %v2922_v25  ;;  %v714_v32 = vadd.f32 %v698_v52, %v614_v2  ;;  %v852_v31 = vld [vmem:[#allocation2 + $0x20] sm:$0xff] }
 0x12d   : > { %v670_v5 = vpop.permute.xlu1 %669  ;;  %v744_v37 = vpop.permute.xlu0 %743 }
 0x12e   : > { %v817_v15 = vadd.f32 %v744_v37, %v705_v27  ;;  %v618_v3 = vadd.f32 %v602_v39, %v518_v43  ;;  %v706_v51 = vadd.f32 %v690_v6, %v606_v20  ;;  %v700_v9 = vmul.f32 %v2951_v50, %v670_v5 }
 0x130   : > { %v833_v7 = vmax.f32 %v817_v15, 0.0  ;;  %v716_v56 = vadd.f32 %v700_v9, %v616_v0  ;;  %v853_v9 = vld [vmem:[#allocation2 + $0x28] sm:$0xff] }
 0x131   : > { %v678_v11 = vpop.permute.xlu1 %677  ;;  %v759_v29 = vpop.permute.xlu0 %758 }
 0x132   : > { %v820_v41 = vadd.f32 %v759_v29, %v708_v14  ;;  %866 = vadd.xlane.f32.xlu1 %v833_v7  ;;  %v702_v49 = vmul.f32 %v2951_v50, %v678_v11  ;;  %v849_v29 = vld [vmem:[#allocation2 + $0x8] sm:$0xff] }
 0x134   : > { %v836_v16 = vmax.f32 %v820_v41, 0.0  ;;  %v718_v61 = vadd.f32 %v702_v49, %v618_v3 }
 0x135   : > { %v769_v13 = vpop.permute.xlu0 %768 }
 0x136   : > { %v822_v17 = vadd.f32 %v769_v13, %v710_v45  ;;  %v739_v30 = vpop.permute.xlu1 %738  ;;  %872 = vadd.xlane.f32.xlu1 %v836_v16  ;;  %v854_v16 = vld [vmem:[#allocation2 + $0x30] sm:$0xff] }
 0x137   : > { %v816_v12 = vadd.f32 %v739_v30, %v2999_v1  ;;  %v850_v30 = vld [vmem:[#allocation2 + $0x10] sm:$0xff] }
 0x138   : > { %v838_v19 = vmax.f32 %v822_v17, 0.0  ;;  %v856_v17 = vld [vmem:[#allocation2 + $0x40] sm:$0xff] }
 0x139   : > { %v832_v44 = vmax.f32 %v816_v12, 0.0  ;;  %v779_v48 = vpop.permute.xlu0 %778 }
 0x13a   : > { %v824_v33 = vadd.f32 %v779_v48, %v712_v24  ;;  %v749_v47 = vpop.permute.xlu1 %748  ;;  %876 = vadd.xlane.f32.xlu1 %v838_v19  ;;  %v858_v24 = vld [vmem:[#allocation2 + $0x50] sm:$0xff] }
 0x13b   : > { %v818_v23 = vadd.f32 %v749_v47, %v706_v51  ;;  %864 = vadd.xlane.f32.xlu0 %v832_v44  ;;  %v851_v44 = vld [vmem:[#allocation2 + $0x18] sm:$0xff] }
 0x13c   : > { %v840_v59 = vmax.f32 %v824_v33, 0.0 }
 0x13d   : > { %v834_v53 = vmax.f32 %v818_v23, 0.0  ;;  %v789_v25 = vpop.permute.xlu0 %788  ;;  %v860_v23 = vld [vmem:[#allocation2 + $0x60] sm:$0xff] }
 0x13e   : > { %v826_v54 = vadd.f32 %v789_v25, %v714_v32  ;;  %v754_v1 = vpop.permute.xlu1 %753  ;;  %880 = vadd.xlane.f32.xlu1 %v840_v59 }
 0x13f   : > { %v819_v35 = vadd.f32 %v754_v1, %v2961_v63  ;;  %868 = vadd.xlane.f32.xlu0 %v834_v53  ;;  %v855_v1 = vld [vmem:[#allocation2 + $0x38] sm:$0xff] }
 0x140   : > { %v842_v55 = vmax.f32 %v826_v54, 0.0  ;;  %v862_v54 = vld [vmem:[#allocation2 + $0x70] sm:$0xff] }
 0x141   : > { %v835_v34 = vmax.f32 %v819_v35, 0.0  ;;  %v799_v57 = vpop.permute.xlu0 %798 }
 0x142   : > { %v828_v36 = vadd.f32 %v799_v57, %v716_v56  ;;  %v764_v60 = vpop.permute.xlu1 %763  ;;  %884 = vadd.xlane.f32.xlu1 %v842_v55 }
 0x143   : > { %v821_v28 = vadd.f32 %v764_v60, %v2965_v4  ;;  %870 = vadd.xlane.f32.xlu0 %v835_v34  ;;  %v857_v34 = vld [vmem:[#allocation2 + $0x48] sm:$0xff]  ;;  %v859_v60 = vld [vmem:[#allocation2 + $0x58] sm:$0xff] }
 0x144   : > { %v844_v2 = vmax.f32 %v828_v36, 0.0 }
 0x145   : > { %v837_v26 = vmax.f32 %v821_v28, 0.0  ;;  %v809_v62 = vpop.permute.xlu0 %808 }
 0x146   : > { %v830_v39 = vadd.f32 %v809_v62, %v718_v61  ;;  %v774_v8 = vpop.permute.xlu1 %773  ;;  %888 = vadd.xlane.f32.xlu1 %v844_v2  ;;  %v861_v61 = vld [vmem:[#allocation2 + $0x68] sm:$0xff] }
 0x147   : > { %v823_v63 = vadd.f32 %v774_v8, %v2970_v10  ;;  %874 = vadd.xlane.f32.xlu0 %v837_v26 }
 0x148   : > { %v846_v50 = vmax.f32 %v830_v39, 0.0  ;;  %v863_v39 = vld [vmem:[#allocation2 + $0x78] sm:$0xff] }
 0x149   : > { %v839_v0 = vmax.f32 %v823_v63, 0.0 }
 0x14a   : > { %v784_v43 = vpop.permute.xlu1 %783  ;;  %892 = vadd.xlane.f32.xlu1 %v846_v50 }
 0x14b   : > { %v825_v27 = vadd.f32 %v784_v43, %v2975_v18  ;;  %878 = vadd.xlane.f32.xlu0 %v839_v0 }
 0x14d   : > { %v841_v5 = vmax.f32 %v825_v27, 0.0  ;;  %v2615_v27 = vmov (!%p1915_p1), 0  }
 0x14e   : > { %v794_v4 = vpop.permute.xlu1 %793  ;;  %2481 = vset.pattern.permute.xlu1 (!%p1915_p1), %v2615_v27  ;;  %2480 = vset.pattern.permute.xlu0 (!%p1915_p1), %v2615_v27 }
 0x14f   : > { %v827_v37 = vadd.f32 %v794_v4, %v2980_v46  ;;  %882 = vadd.xlane.f32.xlu0 %v841_v5 }
 0x151   : > { %v843_v15 = vmax.f32 %v827_v37, 0.0 }
 0x152   : > { %v804_v3 = vpop.permute.xlu1 %803 }
 0x153   : > { %v829_v42 = vadd.f32 %v804_v3, %v2989_v58  ;;  %886 = vadd.xlane.f32.xlu0 %v843_v15  ;;  %v848_v58 = vld [vmem:[#allocation2] sm:$0xff] }
 0x155   : > { %v845_v7 = vmax.f32 %v829_v42, 0.0 }
 0x156   : > { %v814_v10 = vpop.permute.xlu1 %813 }
 0x157   : > { %v831_v14 = vadd.f32 %v814_v10, %v3001_v38  ;;  %890 = vadd.xlane.f32.xlu0 %v845_v7 }
 0x159   : > { %v847_v11 = vmax.f32 %v831_v14, 0.0 }
 0x15b   : > { %894 = vadd.xlane.f32.xlu0 %v847_v11 }
 0x1bf   : > { %v867_v18 = vpop.xlane.xlu1 %866 }
 0x1c0   : > { %v897_v41 = vadd.f32 %v867_v18, %v849_v29 }
 0x1c2   : > { %914 = vst.msk [vmem:[#allocation2 + $0x8] sm:$0xff] %vm912_vm1, %v897_v41 }
 0x1c3   : > { %v873_v46 = vpop.xlane.xlu1 %872 }
 0x1c4   : > { %v900_v40 = vadd.f32 %v873_v46, %v852_v31 }
 0x1c6   : > { %917 = vst.msk [vmem:[#allocation2 + $0x20] sm:$0xff] %vm912_vm1, %v900_v40 }
 0x1c7   : > { %v877_v45 = vpop.xlane.xlu1 %876 }
 0x1c8   : > { %v902_v6 = vadd.f32 %v877_v45, %v854_v16  ;;  %v865_v13 = vpop.xlane.xlu0 %864 }
 0x1c9   : > { %v896_v38 = vadd.f32 %v865_v13, %v848_v58  ;;  %v934_v37 = vld [vmem:[#allocation2 + $0x8] sm:$0xff] (!%p1915_p1) }
 0x1ca   : > { %919 = vst.msk [vmem:[#allocation2 + $0x30] sm:$0xff] %vm912_vm1, %v902_v6  ;;  %v950_v3 = vmul.f32 (!%p1915_p1), 0.00390625, %v934_v37  ;;  %v1130_v37 = vld [vmem:[%s3508_s3 + $0x60] sm:$0xff] (!%p1915_p1) }
 0x1cb   : > { %913 = vst.msk [vmem:[#allocation2] sm:$0xff] %vm912_vm1, %v896_v38  ;;  %v881_v20 = vpop.xlane.xlu1 %880  ;;  %v1118_v38 = vld [vmem:[%s3508_s3] sm:$0xff] (!%p1915_p1) }
 0x1cc   : > { %v904_v12 = vadd.f32 %v881_v20, %v856_v17  ;;  %v869_v52 = vpop.xlane.xlu0 %868  ;;  %v1119_v17 = vld [vmem:[%s3508_s3 + $0x8] sm:$0xff] (!%p1915_p1) }
 0x1cd   : > { %v898_v19 = vadd.f32 %v869_v52, %v850_v30  ;;  %v937_v7 = vld [vmem:[#allocation2 + $0x20] sm:$0xff] (!%p1915_p1)  ;;  %v1139_v52 = vand.u32 (!%p1915_p1), 4294901760, %v1119_v17 }
 0x1ce   : > { %921 = vst.msk [vmem:[#allocation2 + $0x40] sm:$0xff] %vm912_vm1, %v904_v12  ;;  %v953_v14 = vmul.f32 (!%p1915_p1), 0.00390625, %v937_v7  ;;  %v1136_v12 = vand.u32 (!%p1915_p1), 4294901760, %v1118_v38 }
 0x1cf   : > { %915 = vst.msk [vmem:[#allocation2 + $0x10] sm:$0xff] %vm912_vm1, %v898_v19  ;;  %v885_v48 = vpop.xlane.xlu1 %884 }
 0x1d0   : > { %v906_v51 = vadd.f32 %v885_v48, %v858_v24  ;;  %v871_v33 = vpop.xlane.xlu0 %870  ;;  %v3075_v19 = vpack.c.bf16 (!%p1915_p1), %v1139_v52, %v1136_v12  ;;  %v1120_v48 = vld [vmem:[%s3508_s3 + $0x10] sm:$0xff] (!%p1915_p1) }
 0x1d1   : > { %v899_v47 = vadd.f32 %v871_v33, %v851_v44  ;;  %v939_v29 = vld [vmem:[#allocation2 + $0x30] sm:$0xff] (!%p1915_p1) }
 0x1d2   : > { %923 = vst.msk [vmem:[#allocation2 + $0x50] sm:$0xff] %vm912_vm1, %v906_v51  ;;  %v933_v0 = vld [vmem:[#allocation2] sm:$0xff] (!%p1915_p1)  ;;  %v955_v41 = vmul.f32 (!%p1915_p1), 0.00390625, %v939_v29  ;;  %v1121_v51 = vld [vmem:[%s3508_s3 + $0x18] sm:$0xff] (!%p1915_p1) }
 0x1d3   : > { %916 = vst.msk [vmem:[#allocation2 + $0x18] sm:$0xff] %vm912_vm1, %v899_v47  ;;  %v889_v59 = vpop.xlane.xlu1 %888  ;;  %v949_v4 = vmul.f32 (!%p1915_p1), 0.00390625, %v933_v0  ;;  %v1128_v0 = vld [vmem:[%s3508_s3 + $0x50] sm:$0xff] (!%p1915_p1) }
 0x1d4   : > { %v908_v32 = vadd.f32 %v889_v59, %v860_v23  ;;  %v875_v53 = vpop.xlane.xlu0 %874  ;;  %v2616_v23 = vmov (!%p1915_p1), 0.0|0.0   ;;  %v1145_v59 = vand.u32 (!%p1915_p1), 4294901760, %v1121_v51  ;;  %v1166_v27 = vand.u32 (!%p1915_p1), 4294901760, %v1128_v0 }
 0x1d5   : > { %v901_v25 = vadd.f32 %v875_v53, %v853_v9  ;;  %1002 = vperm.xlu0 (!%p1915_p1), %2480, %v949_v4   ;;  %v941_v46 = vld [vmem:[#allocation2 + $0x40] sm:$0xff] (!%p1915_p1)  ;;  %2304 = vmatprep.subr.bf16.mxu0 (!%p1915_p1), %v2616_v23  ;;  %v1142_v9 = vand.u32 (!%p1915_p1), 4294901760, %v1120_v48  ;;  %v3089_v53 = vsub.f32 (!%p1915_p1), %v1119_v17, %v1139_v52 }
 0x1d6   : > { %925 = vst.msk [vmem:[#allocation2 + $0x60] sm:$0xff] %vm912_vm1, %v908_v32  ;;  %v935_v50 = vld [vmem:[#allocation2 + $0x10] sm:$0xff] (!%p1915_p1)  ;;  %v957_v16 = vmul.f32 (!%p1915_p1), 0.00390625, %v941_v46  ;;  %2232 = vmatprep.subr.bf16.mxu1 (!%p1915_p1), %v2616_v23  ;;  %2306 = vmatpush3.bf16.msra.mxu0 (!%p1915_p1), %v3075_v19  ;;  %v3087_v32 = vsub.f32 (!%p1915_p1), %v1118_v38, %v1136_v12  ;;  %v2618_v12 = vmov (!%p1915_p1), 0.0  }
 0x1d7   : > { %918 = vst.msk [vmem:[#allocation2 + $0x28] sm:$0xff] %vm912_vm1, %v901_v25  ;;  %v893_v35 = vpop.xlane.xlu1 %892  ;;  %v951_v5 = vmul.f32 (!%p1915_p1), 0.00390625, %v935_v50  ;;  %2234 = vmatpush3.bf16.msra.mxu1 (!%p1915_p1), %v3075_v19  ;;  %2307 = vmatprep.subr.bf16.mxu0 (!%p1915_p1), %v2616_v23  ;;  %v1236_v52 = vand.u32 (!%p1915_p1), 4294901760, %v3089_v53 }
 0x1d8   : > { %v910_v49 = vadd.f32 %v893_v35, %v862_v54  ;;  %v879_v55 = vpop.xlane.xlu0 %878  ;;  %v1122_v35 = vld [vmem:[%s3508_s3 + $0x20] sm:$0xff] (!%p1915_p1)  ;;  %2235 = vmatprep.subr.bf16.mxu1 (!%p1915_p1), %v2616_v23  ;;  %2159 = vmatprep.mubr.msk.f32.mxu0 (!%p1915_p1), %vm2617_vm2, %v2618_v12 }
 0x1d9   : > { %v903_v56 = vadd.f32 %v879_v55, %v855_v1  ;;  %1012 = vperm.xlu1 (!%p1915_p1), %2481, %v951_v5   ;;  %1007 = vperm.xlu0 (!%p1915_p1), %2480, %v950_v3   ;;  %v943_v45 = vld [vmem:[#allocation2 + $0x50] sm:$0xff] (!%p1915_p1)  ;;  %v3092_v1 = vpack.c.bf16 (!%p1915_p1), %v1145_v59, %v1142_v9  ;;  %v1148_v55 = vand.u32 (!%p1915_p1), 4294901760, %v1122_v35  ;;  %v1172_v3 = vand.u32 (!%p1915_p1), 4294901760, %v1130_v37 }
 0x1da   : > { %927 = vst.msk [vmem:[#allocation2 + $0x70] sm:$0xff] %vm912_vm1, %v910_v49  ;;  %v936_v43 = vld [vmem:[#allocation2 + $0x18] sm:$0xff] (!%p1915_p1)  ;;  %v959_v13 = vmul.f32 (!%p1915_p1), 0.00390625, %v943_v45  ;;  %v1123_v49 = vld [vmem:[%s3508_s3 + $0x28] sm:$0xff] (!%p1915_p1)  ;;  %2054 = vmatprep.mubr.msk.f32.mxu1 (!%p1915_p1), %vm2617_vm2, %v2618_v12 }
 0x1db   : > { %920 = vst.msk [vmem:[#allocation2 + $0x38] sm:$0xff] %vm912_vm1, %v903_v56  ;;  %v952_v15 = vmul.f32 (!%p1915_p1), 0.00390625, %v936_v43  ;;  %v1151_v56 = vand.u32 (!%p1915_p1), 4294901760, %v1123_v49  ;;  %2309 = vmatpush3.bf16.msra.mxu0 (!%p1915_p1), %v3092_v1  ;;  %2237 = vmatpush3.bf16.msra.mxu1 (!%p1915_p1), %v3092_v1  ;;  %v1129_v43 = vld [vmem:[%s3508_s3 + $0x58] sm:$0xff] (!%p1915_p1) }
 0x1dc   : > { %v883_v57 = vpop.xlane.xlu0 %882  ;;  %2310 = vmatprep.subr.bf16.mxu0 (!%p1915_p1), %v2616_v23  ;;  %2238 = vmatprep.subr.bf16.mxu1 (!%p1915_p1), %v2616_v23  ;;  %v1169_v5 = vand.u32 (!%p1915_p1), 4294901760, %v1129_v43 }
 0x1dd   : > { %v905_v36 = vadd.f32 %v883_v57, %v857_v34  ;;  %1017 = vperm.xlu1 (!%p1915_p1), %2481, %v952_v15   ;;  %1022 = vperm.xlu0 (!%p1915_p1), %2480, %v953_v14   ;;  %v945_v20 = vld [vmem:[#allocation2 + $0x60] sm:$0xff] (!%p1915_p1)  ;;  %v3103_v34 = vsub.f32 (!%p1915_p1), %v1120_v48, %v1142_v9  ;;  %v3105_v57 = vsub.f32 (!%p1915_p1), %v1121_v51, %v1145_v59  ;;  %v1131_v15 = vld [vmem:[%s3508_s3 + $0x68] sm:$0xff] (!%p1915_p1)  ;;  %v1133_v14 = vld [vmem:[%s3508_s3 + $0x78] sm:$0xff] (!%p1915_p1) }
 0x1de   : > { %v938_v42 = vld [vmem:[#allocation2 + $0x28] sm:$0xff] (!%p1915_p1)  ;;  %v961_v44 = vmul.f32 (!%p1915_p1), 0.00390625, %v945_v20  ;;  %v3144_v4 = vpack.c.bf16 (!%p1915_p1), %v1169_v5, %v1166_v27  ;;  %v1181_v29 = vand.u32 (!%p1915_p1), 4294901760, %v1133_v14  ;;  %v3182_v45 = vsub.f32 (!%p1915_p1), %v1129_v43, %v1169_v5 }
 0x1df   : > { %922 = vst.msk [vmem:[#allocation2 + $0x48] sm:$0xff] %vm912_vm1, %v905_v36  ;;  %v954_v10 = vmul.f32 (!%p1915_p1), 0.00390625, %v938_v42  ;;  %v3108_v36 = vpack.c.bf16 (!%p1915_p1), %v1151_v56, %v1148_v55  ;;  %v1175_v42 = vand.u32 (!%p1915_p1), 4294901760, %v1131_v15  ;;  %v1229_v20 = vand.u32 (!%p1915_p1), 4294901760, %v3087_v32 }
 0x1e0   : > { %v887_v28 = vpop.xlane.xlu0 %886  ;;  %v1237_v48 = vsub.f32 (!%p1915_p1), %v3089_v53, %v1236_v52 }
 0x1e1   : > { %v907_v2 = vadd.f32 %v887_v28, %v859_v60  ;;  %1027 = vperm.xlu1 (!%p1915_p1), %2481, %v954_v10   ;;  %1032 = vperm.xlu0 (!%p1915_p1), %2480, %v955_v41   ;;  %v947_v47 = vld [vmem:[#allocation2 + $0x70] sm:$0xff] (!%p1915_p1)  ;;  %v1125_v28 = vld [vmem:[%s3508_s3 + $0x38] sm:$0xff] (!%p1915_p1)  ;;  %v3156_v7 = vpack.c.bf16 (!%p1915_p1), %v1175_v42, %v1172_v3  ;;  %v3169_v41 = vsub.f32 (!%p1915_p1), %v1123_v49, %v1151_v56 }
 0x1e2   : > { %v940_v11 = vld [vmem:[#allocation2 + $0x38] sm:$0xff] (!%p1915_p1)  ;;  %v963_v54 = vmul.f32 (!%p1915_p1), 0.00390625, %v947_v47  ;;  %v1124_v60 = vld [vmem:[%s3508_s3 + $0x30] sm:$0xff] (!%p1915_p1)  ;;  %2312 = vmatpush3.bf16.msra.mxu0 (!%p1915_p1), %v3108_v36  ;;  %2240 = vmatpush3.bf16.msra.mxu1 (!%p1915_p1), %v3108_v36  ;;  %v1250_v47 = vand.u32 (!%p1915_p1), 4294901760, %v3105_v57  ;;  %v1238_v9 = vand.u32 (!%p1915_p1), 4294901760, %v1237_v48 }
 0x1e3   : > { %924 = vst.msk [vmem:[#allocation2 + $0x58] sm:$0xff] %vm912_vm1, %v907_v2  ;;  %v956_v18 = vmul.f32 (!%p1915_p1), 0.00390625, %v940_v11  ;;  %v1154_v2 = vand.u32 (!%p1915_p1), 4294901760, %v1124_v60  ;;  %2313 = vmatprep.subr.bf16.mxu0 (!%p1915_p1), %v2616_v23  ;;  %2241 = vmatprep.subr.bf16.mxu1 (!%p1915_p1), %v2616_v23  ;;  %v1132_v10 = vld [vmem:[%s3508_s3 + $0x70] sm:$0xff] (!%p1915_p1) }
 0x1e4   : > { %v891_v26 = vpop.xlane.xlu0 %890  ;;  %v1178_v11 = vand.u32 (!%p1915_p1), 4294901760, %v1132_v10 }
 0x1e5   : > { %v909_v62 = vadd.f32 %v891_v26, %v861_v61  ;;  %932 = sbr.rel (%p1915_p1) target bundleno = 935 (0x3a7), region = 48  ;;  %1037 = vperm.xlu1 (!%p1915_p1), %2481, %v956_v18   ;;  %1042 = vperm.xlu0 (!%p1915_p1), %2480, %v957_v16   ;;  %v1157_v61 = vand.u32 (!%p1915_p1), 4294901760, %v1125_v28  ;;  %v3167_v18 = vsub.f32 (!%p1915_p1), %v1122_v35, %v1148_v55 }
 0x1e6   : > { %v942_v31 = vld [vmem:[#allocation2 + $0x48] sm:$0xff] (!%p1915_p1)  ;;  %v3189_v38 = vpack.c.bf16 (!%p1915_p1), %v1181_v29, %v1178_v11  ;;  %v3191_v17 = vsub.f32 (!%p1915_p1), %v1132_v10, %v1178_v11 }
 0x1e7   : > { %926 = vst.msk [vmem:[#allocation2 + $0x68] sm:$0xff] %vm912_vm1, %v909_v62  ;;  %v958_v40 = vmul.f32 (!%p1915_p1), 0.00390625, %v942_v31  ;;  %v3120_v26 = vpack.c.bf16 (!%p1915_p1), %v1157_v61, %v1154_v2  ;;  %v1126_v62 = vld [vmem:[%s3508_s3 + $0x40] sm:$0xff] (!%p1915_p1)  ;;  %v3171_v31 = vsub.f32 (!%p1915_p1), %v1124_v60, %v1154_v2  ;;  %v3173_v46 = vsub.f32 (!%p1915_p1), %v1125_v28, %v1157_v61 }
 0x1e8   : > { %v895_v8 = vpop.xlane.xlu0 %894  ;;  %v1257_v56 = vand.u32 (!%p1915_p1), 4294901760, %v3167_v18  ;;  %v1264_v60 = vand.u32 (!%p1915_p1), 4294901760, %v3169_v41 }
 0x1e9   : > { %v911_v63 = vadd.f32 %v895_v8, %v863_v39  ;;  %1047 = vperm.xlu1 (!%p1915_p1), %2481, %v958_v40   ;;  %1052 = vperm.xlu0 (!%p1915_p1), %2480, %v959_v13   ;;  %v1127_v39 = vld [vmem:[%s3508_s3 + $0x48] sm:$0xff] (!%p1915_p1)  ;;  %v1160_v8 = vand.u32 (!%p1915_p1), 4294901760, %v1126_v62  ;;  %v3187_v13 = vsub.f32 (!%p1915_p1), %v1131_v15, %v1175_v42 }
 0x1ea   : > { %v944_v58 = vld [vmem:[#allocation2 + $0x58] sm:$0xff] (!%p1915_p1)  ;;  %2315 = vmatpush3.bf16.msra.mxu0 (!%p1915_p1), %v3120_v26  ;;  %2243 = vmatpush3.bf16.msra.mxu1 (!%p1915_p1), %v3120_v26  ;;  %v3221_v2 = vpack.c.bf16 (!%p1915_p1), %v1264_v60, %v1257_v56  ;;  %v1258_v61 = vsub.f32 (!%p1915_p1), %v3167_v18, %v1257_v56 }
 0x1eb   : > { %928 = vst.msk [vmem:[#allocation2 + $0x78] sm:$0xff] %vm912_vm1, %v911_v63  ;;  %v960_v6 = vmul.f32 (!%p1915_p1), 0.00390625, %v944_v58  ;;  %v1163_v63 = vand.u32 (!%p1915_p1), 4294901760, %v1127_v39  ;;  %2316 = vmatprep.subr.bf16.mxu0 (!%p1915_p1), %v2616_v23  ;;  %2244 = vmatprep.subr.bf16.mxu1 (!%p1915_p1), %v2616_v23  ;;  %v3176_v40 = vsub.f32 (!%p1915_p1), %v1126_v62, %v1160_v8  ;;  %v3180_v58 = vsub.f32 (!%p1915_p1), %v1128_v0, %v1166_v27 }
 0x1ec   : > { %v1265_v62 = vsub.f32 %v3169_v41, %v1264_v60  ;;  %v1278_v0 = vand.u32 4294901760, %v3173_v46  ;;  %v1320_v56 = vand.u32 4294901760, %v3187_v13 }
 0x1ed   : > { %1057 = vperm.xlu1 %2481, %v960_v6   ;;  %1062 = vperm.xlu0 %2480, %v961_v44   ;;  %v3132_v50 = vpack.c.bf16 %v1163_v63, %v1160_v8  ;;  %v3178_v16 = vsub.f32 %v1127_v39, %v1163_v63  ;;  %v3185_v6 = vsub.f32 %v1130_v37, %v1172_v3  ;;  %v1259_v39 = vand.u32 4294901760, %v1258_v61 }
 0x1ee   : > { %v946_v30 = vld [vmem:[#allocation2 + $0x68] sm:$0xff]  ;;  %v3203_v44 = vpack.c.bf16 %v1236_v52, %v1229_v20  ;;  %v1266_v8 = vand.u32 4294901760, %v1265_v62  ;;  %v1271_v63 = vand.u32 4294901760, %v3171_v31  ;;  %v1279_v37 = vsub.f32 %v3173_v46, %v1278_v0 }
 0x1ef   : > { %v962_v24 = vmul.f32 0.00390625, %v946_v30  ;;  %2318 = vmatpush3.bf16.msra.mxu0 %v3132_v50  ;;  %2246 = vmatpush3.bf16.msra.mxu1 %v3132_v50  ;;  %v3193_v30 = vsub.f32 %v1133_v14, %v1181_v29  ;;  %v1285_v42 = vand.u32 4294901760, %v3176_v40  ;;  %v1292_v10 = vand.u32 4294901760, %v3178_v16 }
 0x1f0   : > { %2319 = vmatprep.subr.bf16.mxu0 %v2616_v23  ;;  %2247 = vmatprep.subr.bf16.mxu1 %v2616_v23  ;;  %v3227_v43 = vpack.c.bf16 %v1266_v8, %v1259_v39  ;;  %v3229_v27 = vpack.c.bf16 %v1278_v0, %v1271_v63  ;;  %v1272_v5 = vsub.f32 %v3171_v31, %v1271_v63  ;;  %v1280_v3 = vand.u32 4294901760, %v1279_v37 }
 0x1f1   : > { %1067 = vperm.xlu1 %2481, %v962_v24   ;;  %1072 = vperm.xlu0 %2480, %v963_v54   ;;  %v1230_v24 = vsub.f32 %v3087_v32, %v1229_v20  ;;  %v1251_v54 = vsub.f32 %v3105_v57, %v1250_v47  ;;  %v3237_v11 = vpack.c.bf16 %v1292_v10, %v1285_v42  ;;  %v1299_v48 = vand.u32 4294901760, %v3180_v58 }
 0x1f2   : > { %v948_v33 = vld [vmem:[#allocation2 + $0x78] sm:$0xff]  ;;  %v1273_v15 = vand.u32 4294901760, %v1272_v5  ;;  %v1286_v29 = vsub.f32 %v3176_v40, %v1285_v42  ;;  %v1293_v20 = vsub.f32 %v3178_v16, %v1292_v10  ;;  %v1321_v39 = vsub.f32 %v3187_v13, %v1320_v56 }
 0x1f3   : > { %v964_v25 = vmul.f32 0.00390625, %v948_v33  ;;  %2321 = vmatpush3.bf16.msra.mxu0 %v3144_v4  ;;  %2249 = vmatpush3.bf16.msra.mxu1 %v3144_v4  ;;  %v1231_v51 = vand.u32 4294901760, %v1230_v24  ;;  %v1243_v33 = vand.u32 4294901760, %v3103_v34  ;;  %v1252_v55 = vand.u32 4294901760, %v1251_v54 }
 0x1f4   : > { %2322 = vmatprep.subr.bf16.mxu0 %v2616_v23  ;;  %2250 = vmatprep.subr.bf16.mxu1 %v2616_v23  ;;  %v3235_v14 = vpack.c.bf16 %v1280_v3, %v1273_v15  ;;  %v1287_v52 = vand.u32 4294901760, %v1286_v29  ;;  %v1294_v24 = vand.u32 4294901760, %v1293_v20  ;;  %v1322_v63 = vand.u32 4294901760, %v1321_v39 }
 0x1f5   : > { %1077 = vperm.xlu1 %2481, %v964_v25   ;;  %v3211_v59 = vpack.c.bf16 %v1250_v47, %v1243_v33  ;;  %v1244_v25 = vsub.f32 %v3103_v34, %v1243_v33  ;;  %v3215_v35 = vpack.c.bf16 %v1238_v9, %v1231_v51  ;;  %v1306_v51 = vand.u32 4294901760, %v3182_v45 }
 0x1f6   : > { %v3243_v33 = vpack.c.bf16 %v1294_v24, %v1287_v52  ;;  %v1300_v9 = vsub.f32 %v3180_v58, %v1299_v48  ;;  %v1327_v0 = vand.u32 4294901760, %v3191_v17  ;;  %v1334_v5 = vand.u32 4294901760, %v3193_v30 }
 0x1f7   : > { %2324 = vmatpush3.bf16.msra.mxu0 %v3156_v7  ;;  %2252 = vmatpush3.bf16.msra.mxu1 %v3156_v7  ;;  %v1245_v49 = vand.u32 4294901760, %v1244_v25  ;;  %v3245_v47 = vpack.c.bf16 %v1306_v51, %v1299_v48  ;;  %v1307_v25 = vsub.f32 %v3182_v45, %v1306_v51  ;;  %v2281_v52 = vpack.c.bf16 %v3089_v53, %v3087_v32 }
 0x1f8   : > { %2325 = vmatprep.subr.bf16.mxu0 %v2616_v23  ;;  %2253 = vmatprep.subr.bf16.mxu1 %v2616_v23  ;;  %v1301_v54 = vand.u32 4294901760, %v1300_v9  ;;  %v3261_v15 = vpack.c.bf16 %v1334_v5, %v1327_v0  ;;  %v1328_v3 = vsub.f32 %v3191_v17, %v1327_v0  ;;  %v1335_v42 = vsub.f32 %v3193_v30, %v1334_v5 }
 0x1f9   : > { %v3219_v28 = vpack.c.bf16 %v1252_v55, %v1245_v49  ;;  %v1308_v49 = vand.u32 4294901760, %v1307_v25  ;;  %v1313_v55 = vand.u32 4294901760, %v3185_v6  ;;  %v3522_v32 = vpack.c.bf16 %v3169_v41, %v3167_v18 }
 0x1fa   : > { %v1329_v10 = vand.u32 4294901760, %v1328_v3  ;;  %v1336_v29 = vand.u32 4294901760, %v1335_v42  ;;  %v3523_v53 = vpack.c.bf16 %v3173_v46, %v3171_v31 }
 0x1fb   : > { %2327 = vmatpush3.bf16.msra.mxu0 %v3189_v38  ;;  %2255 = vmatpush3.bf16.msra.mxu1 %v3189_v38  ;;  %v3251_v60 = vpack.c.bf16 %v1308_v49, %v1301_v54  ;;  %v3253_v61 = vpack.c.bf16 %v1320_v56, %v1313_v55  ;;  %v1314_v62 = vsub.f32 %v3185_v6, %v1313_v55  ;;  %v3284_v55 = vand.u32 127, %v400_v21 }
 0x1fc   : > { %2328 = vmatprep.subr.bf16.mxu0 %v2616_v23  ;;  %2256 = vmatprep.subr.bf16.mxu1 %v2616_v23  ;;  %v3265_v20 = vpack.c.bf16 %v1336_v29, %v1329_v10  ;;  %v967_v56 = vadd.s32 8, %v2819_v22  ;;  %v970_v21 = vadd.s32 32, %v2819_v22  ;;  %v971_v29 = vadd.s32 40, %v2819_v22 }
 0x1fd   : > { %v1315_v8 = vand.u32 4294901760, %v1314_v62  ;;  %v968_v62 = vadd.s32 16, %v2819_v22  ;;  %vm984_vm3 = vcmp.eq.s32.totalorder %v2819_v22, %v3284_v55 }
 0x1fe   : > { %vm985_vm4 = vcmp.eq.s32.totalorder %v967_v56, %v3284_v55  ;;  %vm988_vm7 = vcmp.eq.s32.totalorder %v970_v21, %v3284_v55  ;;  %v972_v56 = vadd.s32 48, %v2819_v22  ;;  %vm989_vm8 = vcmp.eq.s32.totalorder %v971_v29, %v3284_v55 }
 0x1ff   : > { %v3259_v37 = vpack.c.bf16 %v1322_v63, %v1315_v8  ;;  %v969_v63 = vadd.s32 24, %v2819_v22  ;;  %vm986_vm5 = vcmp.eq.s32.totalorder %v968_v62, %v3284_v55 }
 0x200   : > { %vm990_vm9 = vcmp.eq.s32.totalorder %v972_v56, %v3284_v55 }
 0x201   : > { %vm987_vm6 = vcmp.eq.s32.totalorder %v969_v63, %v3284_v55 }
 0x254   : > { %v1003_v8 = vpop.permute.xlu0 %1002 }
 0x255   : > { %v1080_v3 = vsel %vm984_vm3, %v1003_v8, 0.0  ;;  %v973_v8 = vadd.s32 56, %v2819_v22 }
 0x257   : > { %vm991_vm10 = vcmp.eq.s32.totalorder %v973_v8, %v3284_v55 }
 0x258   : > { %v1013_v39 = vpop.permute.xlu1 %1012  ;;  %v1008_v5 = vpop.permute.xlu0 %1007 }
 0x259   : > { %v1081_v42 = vsel %vm985_vm4, %v1008_v5, 0.0  ;;  %v1082_v49 = vsel %vm986_vm5, %v1013_v39, 0.0 }
 0x25a   : > { %v1096_v10 = vadd.f32 %v1081_v42, %v1080_v3  ;;  %v975_v42 = vadd.s32 72, %v2819_v22 }
 0x25c   : > { %v1018_v0 = vpop.permute.xlu1 %1017  ;;  %v1097_v54 = vadd.f32 %v1096_v10, %v1082_v49  ;;  %v1023_v9 = vpop.permute.xlu0 %1022  ;;  %v974_v49 = vadd.s32 64, %v2819_v22  ;;  %vm993_vm12 = vcmp.eq.s32.totalorder %v975_v42, %v3284_v55 }
 0x25d   : > { %v1083_v62 = vsel %vm987_vm6, %v1018_v0, 0.0  ;;  %v1084_v5 = vsel %vm988_vm7, %v1023_v9, 0.0 }
 0x25e   : > { %v1098_v51 = vadd.f32 %v1097_v54, %v1083_v62  ;;  %vm992_vm11 = vcmp.eq.s32.totalorder %v974_v49, %v3284_v55  ;;  %v977_v62 = vadd.s32 88, %v2819_v22 }
 0x260   : > { %v1028_v25 = vpop.permute.xlu1 %1027  ;;  %v1099_v48 = vadd.f32 %v1098_v51, %v1084_v5  ;;  %v1033_v3 = vpop.permute.xlu0 %1032  ;;  %v976_v51 = vadd.s32 80, %v2819_v22  ;;  %vm995_vm14 = vcmp.eq.s32.totalorder %v977_v62, %v3284_v55 }
 0x261   : > { %v1085_v39 = vsel %vm989_vm8, %v1028_v25, 0.0  ;;  %v1086_v0 = vsel %vm990_vm9, %v1033_v3, 0.0  ;;  %v978_v3 = vadd.s32 96, %v2819_v22 }
 0x262   : > { %v1100_v21 = vadd.f32 %v1099_v48, %v1085_v39  ;;  %vm994_vm13 = vcmp.eq.s32.totalorder %v976_v51, %v3284_v55 }
 0x263   : > { %vm996_vm15 = vcmp.eq.s32.totalorder %v978_v3, %v3284_v55 }
 0x264   : > { %v1038_v63 = vpop.permute.xlu1 %1037  ;;  %v1101_v10 = vadd.f32 %v1100_v21, %v1086_v0  ;;  %v1043_v54 = vpop.permute.xlu0 %1042  ;;  %v979_v21 = vadd.s32 104, %v2819_v22 }
 0x265   : > { %v1087_v9 = vsel %vm991_vm10, %v1038_v63, 0.0  ;;  %v1088_v25 = vsel %vm992_vm11, %v1043_v54, 0.0  ;;  %v980_v54 = vadd.s32 112, %v2819_v22 }
 0x266   : > { %v1102_v56 = vadd.f32 %v1101_v10, %v1087_v9  ;;  %vm997_vm0 = vcmp.eq.s32.totalorder %v979_v21, %v3284_v55 }
 0x267   : > { %vm998_vm1 = vcmp.eq.s32.totalorder %v980_v54, %v3284_v55 }
 0x268   : > { %v1048_v29 = vpop.permute.xlu1 %1047  ;;  %v1103_v5 = vadd.f32 %v1102_v56, %v1088_v25  ;;  %v1053_v48 = vpop.permute.xlu0 %1052  ;;  %v981_v56 = vadd.s32 120, %v2819_v22 }
 0x269   : > { %v1089_v39 = vsel %vm993_vm12, %v1048_v29, 0.0  ;;  %v1090_v63 = vsel %vm994_vm13, %v1053_v48, 0.0 }
 0x26a   : > { %v1104_v49 = vadd.f32 %v1103_v5, %v1089_v39  ;;  %vm999_vm3 = vcmp.eq.s32.totalorder %v981_v56, %v3284_v55 }
 0x26c   : > { %v1058_v8 = vpop.permute.xlu1 %1057  ;;  %v1105_v0 = vadd.f32 %v1104_v49, %v1090_v63  ;;  %v1063_v10 = vpop.permute.xlu0 %1062 }
 0x26d   : > { %v1091_v9 = vsel %vm995_vm14, %v1058_v8, 0.0  ;;  %v1092_v29 = vsel %vm996_vm15, %v1063_v10, 0.0 }
 0x26e   : > { %v1106_v51 = vadd.f32 %v1105_v0, %v1091_v9 }
 0x270   : > { %v1068_v42 = vpop.permute.xlu1 %1067  ;;  %v1107_v25 = vadd.f32 %v1106_v51, %v1092_v29  ;;  %v1073_v62 = vpop.permute.xlu0 %1072 }
 0x271   : > { %v1093_v5 = vsel %vm997_vm0, %v1068_v42, 0.0  ;;  %v1094_v39 = vsel %vm998_vm1, %v1073_v62, 0.0 }
 0x272   : > { %v1108_v3 = vadd.f32 %v1107_v25, %v1093_v5 }
 0x274   : > { %v1078_v48 = vpop.permute.xlu1 %1077  ;;  %v1109_v49 = vadd.f32 %v1108_v3, %v1094_v39 }
 0x275   : > { %v1095_v63 = vsel %vm999_vm3, %v1078_v48, 0.0 }
 0x276   : > { %v1110_v8 = vadd.f32 %v1109_v49, %v1095_v63 }
 0x278   : > { %v1111_v24 = vrot.slane %v1110_v8, 4 }
 0x27a   : > { %v1112_v21 = vadd.f32 %v1111_v24, %v1110_v8 }
 0x27c   : > { %v1113_v0 = vrot.slane %v1112_v21, 2 }
 0x27e   : > { %v1114_v9 = vadd.f32 %v1113_v0, %v1112_v21 }
 0x280   : > { %v1115_v22 = vrot.slane %v1114_v9, 1 }
 0x282   : > { %v1116_v10 = vadd.f32 %v1115_v22, %v1114_v9 }
 0x284   : > { %1117 = vst [vmem:[%s267_s11] sm:$0x1] %v1116_v10  ;;  %v3320_v54 = vand.u32 4294901760, %v1116_v10 }
 0x286   : > { %v3323_v42 = vsub.f32 %v1116_v10, %v3320_v54 }
 0x288   : > { %v1218_v55 = vand.u32 4294901760, %v3323_v42 }
 0x28a   : > { %2160 = vmatmul.mubr.f32.vlgmr.msra.gmra.mrb[0].mxu0 %v1218_v55  ;;  %v1219_v51 = vsub.f32 %v3323_v42, %v1218_v55 }
 0x28b   : > { %2330 = vmatpush3.bf16.msra.mxu0 %v3203_v44  ;;  %2194 = vmatprep.mubr.msk.f32.mxu0 %vm2617_vm2, %v2618_v12 }
 0x28c   : > { %2331 = vmatprep.subr.bf16.mxu0 %v2616_v23  ;;  %v1220_v24 = vand.u32 4294901760, %v1219_v51 }
 0x28e   : > { %2055 = vmatmul.mubr.f32.vlgmr.msra.gmra.mrb[0].mxu1 %v1220_v24 }
 0x28f   : > { %2258 = vmatpush3.bf16.msra.mxu1 %v3215_v35  ;;  %2333 = vmatpush3.bf16.msra.mxu0 %v3211_v59 }
 0x290   : > { %2259 = vmatprep.subr.bf16.mxu1 %v2616_v23  ;;  %2334 = vmatprep.subr.bf16.mxu0 %v2616_v23 }
 0x291   : > { %2089 = vmatprep.mubr.msk.f32.mxu1 %vm2617_vm2, %v2618_v12 }
 0x293   : > { %2261 = vmatpush3.bf16.msra.mxu1 %v3219_v28  ;;  %2336 = vmatpush3.bf16.msra.mxu0 %v3221_v2 }
 0x294   : > { %2262 = vmatprep.subr.bf16.mxu1 %v2616_v23  ;;  %2337 = vmatprep.subr.bf16.mxu0 %v2616_v23 }
 0x297   : > { %2264 = vmatpush3.bf16.msra.mxu1 %v3227_v43  ;;  %2339 = vmatpush3.bf16.msra.mxu0 %v3229_v27 }
 0x298   : > { %2265 = vmatprep.subr.bf16.mxu1 %v2616_v23  ;;  %2340 = vmatprep.subr.bf16.mxu0 %v2616_v23 }
 0x29b   : > { %2267 = vmatpush3.bf16.msra.mxu1 %v3235_v14  ;;  %2342 = vmatpush3.bf16.msra.mxu0 %v3237_v11 }
 0x29c   : > { %2268 = vmatprep.subr.bf16.mxu1 %v2616_v23  ;;  %2343 = vmatprep.subr.bf16.mxu0 %v2616_v23 }
 0x29f   : > { %2270 = vmatpush3.bf16.msra.mxu1 %v3243_v33  ;;  %2345 = vmatpush3.bf16.msra.mxu0 %v3245_v47 }
 0x2a0   : > { %2271 = vmatprep.subr.bf16.mxu1 %v2616_v23  ;;  %2346 = vmatprep.subr.bf16.mxu0 %v2616_v23 }
 0x2a3   : > { %2273 = vmatpush3.bf16.msra.mxu1 %v3251_v60  ;;  %2348 = vmatpush3.bf16.msra.mxu0 %v3253_v61 }
 0x2a4   : > { %2274 = vmatprep.subr.bf16.mxu1 %v2616_v23  ;;  %2349 = vmatprep.subr.bf16.mxu0 %v2616_v23 }
 0x2a7   : > { %2276 = vmatpush3.bf16.msra.mxu1 %v3259_v37  ;;  %2351 = vmatpush3.bf16.msra.mxu0 %v3261_v15 }
 0x2a8   : > { %2277 = vmatprep.subr.bf16.mxu1 %v2616_v23  ;;  %2352 = vmatprep.subr.bf16.mxu0 %v2616_v23 }
 0x2aa   : > { %2195 = vmatmul.mubr.f32.vlgmr.msra.gmra.mrb[0].mxu0 %v3320_v54 }
 0x2ab   : > { %2279 = vmatpush3.bf16.msra.mxu1 %v3265_v20  ;;  %2354 = vmatpush3.bf16.msra.mxu0 %v3075_v19  ;;  %v3521_v19 = vpack.c.bf16 %v3105_v57, %v3103_v34  ;;  %v3525_v34 = vpack.c.bf16 %v3182_v45, %v3180_v58  ;;  %v3526_v57 = vpack.c.bf16 %v3187_v13, %v3185_v6 }
 0x2ac   : > { %2280 = vmatprep.subr.bf16.mxu1 %v2616_v23  ;;  %2355 = vmatprep.subr.bf16.mxu0 %v2616_v23 }
 0x2ad   : > { %2229 = vmatprep.mubr.msk.f32.mxu0 %vm2617_vm2, %v2618_v12 }
 0x2ae   : > { %2090 = vmatmul.mubr.f32.vlgmr.msra.gmra.mrb[0].mxu1 %v3320_v54 }
 0x2af   : > { %2282 = vmatpush3.bf16.msra.mxu1 %v2281_v52  ;;  %2357 = vmatpush3.bf16.msra.mxu0 %v3092_v1  ;;  %v3524_v1 = vpack.c.bf16 %v3178_v16, %v3176_v40 }
 0x2b0   : > { %2283 = vmatprep.subr.bf16.mxu1 %v2616_v23  ;;  %2358 = vmatprep.subr.bf16.mxu0 %v2616_v23 }
 0x2b1   : > { %2124 = vmatprep.mubr.msk.f32.mxu1 %vm2617_vm2, %v2618_v12 }
 0x2b3   : > { %2285 = vmatpush3.bf16.msra.mxu1 %v3521_v19  ;;  %2360 = vmatpush3.bf16.msra.mxu0 %v3108_v36  ;;  %v3527_v36 = vpack.c.bf16 %v3193_v30, %v3191_v17 }
 0x2b4   : > { %2286 = vmatprep.subr.bf16.mxu1 %v2616_v23  ;;  %2361 = vmatprep.subr.bf16.mxu0 %v2616_v23 }
 0x2b7   : > { %2288 = vmatpush3.bf16.msra.mxu1 %v3522_v32  ;;  %2363 = vmatpush3.bf16.msra.mxu0 %v3120_v26 }
 0x2b8   : > { %2289 = vmatprep.subr.bf16.mxu1 %v2616_v23  ;;  %2364 = vmatprep.subr.bf16.mxu0 %v2616_v23 }
 0x2bb   : > { %2291 = vmatpush3.bf16.msra.mxu1 %v3523_v53  ;;  %2366 = vmatpush3.bf16.msra.mxu0 %v3132_v50 }
 0x2bc   : > { %2292 = vmatprep.subr.bf16.mxu1 %v2616_v23  ;;  %2367 = vmatprep.subr.bf16.mxu0 %v2616_v23 }
 0x2bf   : > { %2294 = vmatpush3.bf16.msra.mxu1 %v3524_v1  ;;  %2369 = vmatpush3.bf16.msra.mxu0 %v3144_v4  ;;  %v1134_v4 = vld [vmem:[%s3509_s4] sm:$0x1] }
 0x2c0   : > { %2295 = vmatprep.subr.bf16.mxu1 %v2616_v23  ;;  %2370 = vmatprep.subr.bf16.mxu0 %v2616_v23 }
 0x2c3   : > { %2297 = vmatpush3.bf16.msra.mxu1 %v3525_v34  ;;  %2372 = vmatpush3.bf16.msra.mxu0 %v3156_v7 }
 0x2c4   : > { %2298 = vmatprep.subr.bf16.mxu1 %v2616_v23  ;;  %2373 = vmatprep.subr.bf16.mxu0 %v2616_v23 }
 0x2c7   : > { %2300 = vmatpush3.bf16.msra.mxu1 %v3526_v57  ;;  %2375 = vmatpush3.bf16.msra.mxu0 %v3189_v38 }
 0x2c8   : > { %2301 = vmatprep.subr.bf16.mxu1 %v2616_v23 }
 0x2ca   : > { %2230 = vmatmul.mubr.f32.vlgmr.msra.gmra.mrb[0].mxu0 %v3320_v54 }
 0x2cb   : > { %2303 = vmatpush3.bf16.msra.mxu1 %v3527_v36 }
 0x2ce   : > { %2125 = vmatmul.mubr.f32.vlgmr.msra.gmra.mrb[0].mxu1 %v3323_v42 }
 0x39d   : > { %v1772_v26 = vpop.f32.mrb[0].mxu0 }
 0x39e   : > { %v2231_v50 = vpop.f32.mrb[1].mxu0 }
 0x3a1   : > { %v1477_v7 = vpop.f32.mrb[0].mxu1 }
 0x3a2   : > { %v2376_v18 = vadd.f32 %v1477_v7, %v1134_v4  ;;  %v2126_v41 = vpop.f32.mrb[1].mxu1 }
 0x3a4   : > { %v2377_v31 = vadd.f32 %v2376_v18, %v1772_v26 }
 0x3a6   : > { %1776 = vst [vmem:[%s3528_s15] sm:$0x1] %v2377_v31 }
 0x3a7 PF: > { %s3512_s16 = sshll.u32 %s2596_s25, 4  ;;  %s1794_s30 = sshll.u32 %s267_s11, 4  ;;  %s1795_s30 = int_to_ptr.vmem [resolvable:$true] %s1794_s30 }
 0x3a8   : > { %s3428_s18 = scalar_lea.hbm %s3510_s5, %s3512_s16  ;;  %s1778_s24 = scalar_lea.sflag [#allocation4], %s2726_s14 }
 0x3a9   : > { %s2482_s19 = scalar_lea.vmem %s1795_s30, 16  ;;  %s2619_s20 = smov [#allocation3]  }
 0x3aa   : > { %p2483_p2 = scmp.ne.s32.totalorder %s1795_s30, %s2482_s19  ;;  %s2486_s29 = sshll.u32 %s2619_s20, 4  ;;  %s2487_s29 = int_to_ptr.vmem [resolvable:$false] %s2486_s29 }
 0x3ab   : > { %s2488_s15 = scalar_lea.vmem %s2487_s29, 32  ;;  %p2489_p6 = scmp.lt.s32.totalorder %s1795_s30, %s2487_s29 }
 0x3ac   : > { %p2484_p4 = pnand %p2483_p2, %p2705_p3  ;;  %p2490_p7 = scmp.lt.s32.totalorder %s2488_s15, %s2482_s19 }
 0x3ae   : > { %p2485_p5 = pneg %p2484_p4  ;;  %p2491_p8 = por %p2490_p7, %p2489_p6 }
 0x3b0   : > { %p2492_p10 = pnand %p2491_p8, %p2485_p5 }
 0x3b2   : > { %2495 = shalt.err (!%p2492_p10)
}
 0x3b3   : > { %s2496_s11 = scalar_lea.hbm %s3428_s18, 16  ;;  %s2500_s20 = scalar_lea.hbm %s3510_s5, 32 }
 0x3b4   : > { %p2497_p11 = scmp.ne.s32.totalorder %s3428_s18, %s2496_s11  ;;  %p2501_p0 = scmp.lt.u32.totalorder %s3428_s18, %s3510_s5 }
 0x3b5   : > { %p2502_p1 = scmp.lt.u32.totalorder %s2500_s20, %s2496_s11  ;;  %p2504_p4 = scmp.lt.u32.totalorder %s2496_s11, %s3428_s18 }
 0x3b6   : > { %p2498_p12 = pnand %p2497_p11, %p2705_p3 }
 0x3b7   : > { %p2503_p2 = por %p2502_p1, %p2501_p0 }
 0x3b8   : > { %p2499_p13 = pneg %p2498_p12 }
 0x3b9   : > { %p2505_p5 = por %p2504_p4, %p2503_p2 }
 0x3bb   : > { %p2506_p6 = pnand %p2505_p5, %p2499_p13 }
 0x3bd   : > { %2509 = shalt.err (!%p2506_p6)
}
 0x3be   : > { %2386 = dma.vmem_to_hbm [thread:$0]  (%p2705_p3), %s1795_s30, 16, %s3428_s18, %s1778_s24  }
 0x3bf   : > { %s3529_s19 = sshll.u32 %s2596_s25, 4  ;;  %s3530_s12 = scalar_lea.vmem [#allocation5], %s2726_s14 }
 0x3c0   : > { %s3455_s16 = scalar_lea.hbm %s3511_s6, %s3529_s19  ;;  %s1807_s20 = sshll.u32 %s3530_s12, 4  ;;  %s1808_s20 = int_to_ptr.vmem [resolvable:$true] %s1807_s20 }
 0x3c1   : > { %s1782_s11 = scalar_lea.sflag [#allocation6], %s2726_s14  ;;  %s2510_s29 = scalar_lea.vmem %s1808_s20, 16 }
 0x3c2   : > { %p2511_p7 = scmp.ne.s32.totalorder %s1808_s20, %s2510_s29  ;;  %s2620_s0 = smov [#allocation5]  }
 0x3c3   : > { %s2514_s1 = sshll.u32 %s2620_s0, 4  ;;  %s2515_s1 = int_to_ptr.vmem [resolvable:$false] %s2514_s1 }
 0x3c4   : > { %p2512_p8 = pnand %p2511_p7, %p2705_p3  ;;  %s2516_s2 = scalar_lea.vmem %s2515_s1, 32 }
 0x3c5   : > { %p2517_p11 = scmp.lt.s32.totalorder %s1808_s20, %s2515_s1  ;;  %p2518_p12 = scmp.lt.s32.totalorder %s2516_s2, %s2510_s29 }
 0x3c6   : > { %p2513_p10 = pneg %p2512_p8 }
 0x3c7   : > { %p2519_p13 = por %p2518_p12, %p2517_p11 }
 0x3c9   : > { %p2520_p0 = pnand %p2519_p13, %p2513_p10 }
 0x3cb   : > { %2523 = shalt.err (!%p2520_p0)
}
 0x3cc   : > { %s2524_s25 = scalar_lea.hbm %s3455_s16, 16  ;;  %s2528_s0 = scalar_lea.hbm %s3511_s6, 32 }
 0x3cd   : > { %p2525_p1 = scmp.ne.s32.totalorder %s3455_s16, %s2524_s25  ;;  %p2529_p5 = scmp.lt.u32.totalorder %s3455_s16, %s3511_s6 }
 0x3ce   : > { %p2530_p6 = scmp.lt.u32.totalorder %s2528_s0, %s2524_s25  ;;  %p2532_p8 = scmp.lt.u32.totalorder %s2524_s25, %s3455_s16 }
 0x3cf   : > { %p2526_p2 = pnand %p2525_p1, %p2705_p3 }
 0x3d0   : > { %p2531_p7 = por %p2530_p6, %p2529_p5 }
 0x3d1   : > { %p2527_p4 = pneg %p2526_p2 }
 0x3d2   : > { %p2533_p10 = por %p2532_p8, %p2531_p7 }
 0x3d4   : > { %p2534_p11 = pnand %p2533_p10, %p2527_p4 }
 0x3d6   : > { %2537 = shalt.err (!%p2534_p11)
}
 0x3d7   : > { %2387 = dma.vmem_to_hbm [thread:$0]  (%p2705_p3), %s1808_s20, 16, %s3455_s16, %s1782_s11  }
 0x3d8 PF: > { %p2397_p12 = scmp.ge.s32.totalorder %s2608_s28, 2  ;;  %s1819_s2 = sand.u32 1, %s2580_s21  }
 0x3d9   : > { %s1820_s24 = scalar_lea.sflag [#allocation4], %s1819_s2 }
 0x3da   : > { %p2391_p13 = pnand %p2397_p12, %p2715_p9 }
 0x3dc   : > { %2571 = dma.done.wait (!%p2391_p13), %s1820_s24, 16  }
 0x3dd   : > { %2573 = vsyncadd (!%p2391_p13), %s1820_s24, 4294967280  ;;  %s1828_s19 = scalar_lea.sflag [#allocation6], %s1819_s2 }
 0x3de   : > { %2575 = dma.done.wait (!%p2391_p13), %s1828_s19, 16  }
 0x3df   : > { %2577 = vsyncadd (!%p2391_p13), %s1828_s19, 4294967280  ;;  %s23_s28 = sadd.s32 1, %s2608_s28   ;;  %s3531_s21 = smov %s2584_s22 }
 0x3e0   : > { %p20_p0 = scmp.ge.s32.totalorder %s23_s28, 6   ;;  %s3532_s22 = smov %s2588_s23 }
 0x3e1   : > { %s3533_s23 = smov %s2723_s13  ;;  %s3534_s24 = smov %s2600_s26 }
 0x3e2   : > { %s3535_s25 = smov %s2604_s27  ;;  %s3536_s26 = smov %s3539_s7 }
 0x3e3   : > { %s3537_s27 = smov %s3543_s8  ;;  %22 = sbr.rel (!%p20_p0) target bundleno = 11 (0xb), region = 100 }
 0x3ea   :  { %1832 = vsyncpa [#allocation4], 1 }
 0x3eb   :  { %1834 = vsyncpa [#allocation4 + $0x1], 1 }
 0x3ec   :  { %1835 = vsyncpa [#allocation6], 1 }
 0x3ed   :  { %1837 = vsyncpa [#allocation6 + $0x1], 1 }

</bundles_post_ra>
